<compile_context>
chip_gen: v7x
topology: tpu7x:2x2x1
jax: 0.10.0
libtpu: 0.0.40
codegen_flags: <defaults>
</compile_context>

<pallas_src>
import jax
import jax.numpy as jnp
import numpy as np
from jax.experimental import pallas as pl
from jax.experimental.pallas import tpu as pltpu

K = 5          # conv kernel size (both convs)
KP1 = 32       # conv1 contraction dim, zero-padded 25 -> 32 (tile/MXU friendly)


# ------------------------------ fused kernel ------------------------------- #

def fused_forward_kernel(p1_ref, w1_ref, b1_ref, w2_ref, b2_ref,
                         wf1_ref, bf1_ref, wf2_ref, bf2_ref,
                         o_ref,
                         h1_ref, h2_ref):
    """conv1+relu -> conv2+relu -> fc1+relu -> fc2, all VMEM resident.

    p1_ref : (bb, 8, 8, 32)   conv1 im2col patches (built in XLA, K padded)
    w1_ref : (32, 10)         b1_ref : (1, 1, 1, 10)
    w2_ref : (25, 10, 20)     b2_ref : (1, 1, 1, 20)   per-tap conv2 weights
    wf1_ref: (16, 20, 50)     bf1_ref: (1, 1, 1, 50)   per-position fc1 weights
    wf2_ref: (50, 10)         bf2_ref: (1, 1, 1, 10)
    o_ref  : (bb, 1, 1, 10)
    scratch: h1 (bb, 8, 8, 10), h2 (bb, 4, 4, 20)
    """
    h1s = p1_ref.shape[1]              # 8
    h2s = h1s - K + 1                  # 4
    dn = (((3,), (0,)), ((), ()))      # contract lhs last dim with rhs first dim

    # ---- conv1: ONE MXU contraction over the padded patch dim (K = 32) ----
    a1 = jax.lax.dot_general(p1_ref[...], w1_ref[...], dn,
                             preferred_element_type=jnp.float32)
    h1_ref[...] = jnp.maximum(a1 + b1_ref[...], 0.0)

    # ---- conv2: direct accumulation over 25 taps (no patch buffer, no
    #      masked narrow stores -- only window slice loads + small dots). ----
    acc2 = None
    for kh in range(K):
        for kw in range(K):
            tap = jax.lax.dot_general(
                h1_ref[:, kh:kh + h2s, kw:kw + h2s, :], w2_ref[kh * K + kw],
                dn, preferred_element_type=jnp.float32)
            acc2 = tap if acc2 is None else acc2 + tap
    h2_ref[...] = jnp.maximum(acc2 + b2_ref[...], 0.0)

    # ---- fc1: accumulate per spatial position against its (20, 50) weight
    #      block. The flatten buffer + 16 masked copies are eliminated; the
    #      torch NCHW flatten permutation is folded into wf1 at pack time. ----
    acc3 = None
    for s in range(h2s * h2s):
        i, j = s // h2s, s % h2s
        t = jax.lax.dot_general(h2_ref[:, i:i + 1, j:j + 1, :], wf1_ref[s],
                                dn, preferred_element_type=jnp.float32)
        acc3 = t if acc3 is None else acc3 + t
    h3 = jnp.maximum(acc3 + bf1_ref[...], 0.0)            # (bb, 1, 1, 50)

    # ---- fc2 ----
    out = jax.lax.dot_general(h3, wf2_ref[...], dn,
                              preferred_element_type=jnp.float32) + bf2_ref[...]
    o_ref[...] = out.astype(o_ref.dtype)                   # (bb, 1, 1, 10)


# ------------------------------ wrappers ------------------------------------ #

def _full_spec(arr):
    nd = arr.ndim
    return pl.BlockSpec(arr.shape, lambda i, _nd=nd: (0,) * _nd)


def fused_forward(patches, p, block_b):
    """patches: (Bp, 8, 8, 32) with Bp % block_b == 0. Returns (Bp, 1, 1, 10)."""
    Bp, h1s, _, kp = patches.shape
    h2s = h1s - K + 1
    c1 = p["w1"].shape[1]
    c2 = p["w2"].shape[2]
    n_out = p["wf2"].shape[1]

    args = (patches, p["w1"], p["b1"], p["w2"], p["b2"],
            p["wf1"], p["bf1"], p["wf2"], p["bf2"])
    in_specs = [pl.BlockSpec((block_b, h1s, h1s, kp), lambda i: (i, 0, 0, 0))]
    in_specs += [_full_spec(a) for a in args[1:]]

    return pl.pallas_call(
        fused_forward_kernel,
        out_shape=jax.ShapeDtypeStruct((Bp, 1, 1, n_out), jnp.float32),
        grid=(Bp // block_b,),
        in_specs=in_specs,
        out_specs=pl.BlockSpec((block_b, 1, 1, n_out), lambda i: (i, 0, 0, 0)),
        scratch_shapes=[
            pltpu.VMEM((block_b, h1s, h1s, c1), jnp.float32),   # h1 (post-relu)
            pltpu.VMEM((block_b, h2s, h2s, c2), jnp.float32),   # h2 (post-relu)
        ],
        compiler_params=pltpu.CompilerParams(
            dimension_semantics=("parallel",),
            vmem_limit_bytes=48 * 1024 * 1024),
    )(*args)


def pack_params(params):
    """One-time repack of PyTorch-layout params into kernel-native layouts."""
    c1 = params["conv1_w"].shape[0]            # 10
    c2 = params["conv2_w"].shape[0]            # 20
    ci2 = params["conv2_w"].shape[1]           # 10
    n_hid, n_flat = params["fc1_w"].shape      # 50, 320
    n_spatial = n_flat // c2                   # 16 spatial positions after conv2
    # conv1: (Cout, Cin, KH, KW) -> (KH*KW*Cin, Cout), zero-pad rows 25 -> 32.
    w1 = jnp.transpose(params["conv1_w"], (2, 3, 1, 0)).reshape(K * K, c1)
    w1 = jnp.pad(w1, ((0, KP1 - K * K), (0, 0)))
    # conv2: (Cout, Cin, KH, KW) -> per-tap (KH*KW, Cin, Cout) blocks.
    w2 = jnp.transpose(params["conv2_w"], (2, 3, 1, 0)).reshape(K * K, ci2, c2)
    # fc1: torch flattens NCHW (col = c*16 + s); repack into (s, c, n_hid) blocks.
    wf1 = jnp.transpose(params["fc1_w"].reshape(n_hid, c2, n_spatial), (2, 1, 0))
    wf2 = params["fc2_w"].T
    return {
        "w1": w1, "b1": params["conv1_b"].reshape(1, 1, 1, c1),
        "w2": w2, "b2": params["conv2_b"].reshape(1, 1, 1, c2),
        "wf1": wf1, "bf1": params["fc1_b"].reshape(1, 1, 1, n_hid),
        "wf2": wf2, "bf2": params["fc2_b"].reshape(1, 1, 1, -1),
    }


def _pick_block_b(B):
    cap = 128                       # per-step footprint stays well under 48 MiB
    if B <= 1:
        return 1
    return min(-(-B // 2), cap)     # >= 2 grid steps -> both v7x TensorCores busy


@jax.jit
def simple_model_forward(x_nchw, packed):
    B, cin, hin, win = x_nchw.shape
    assert cin == 1 and hin == win
    h1s = hin - K + 1
    # Cin == 1: drop the channel dim (avoids 1 -> 128 lane padding downstream).
    x2 = x_nchw.reshape(B, hin, hin)
    # conv1 im2col in XLA: kernel receives a lane-aligned (B, 8, 8, 32) patch
    # tensor instead of assembling 25 single-lane masked stores per grid step.
    patches = jnp.stack([x2[:, kh:kh + h1s, kw:kw + h1s]
                         for kh in range(K) for kw in range(K)], axis=-1)
    patches = jnp.pad(patches, ((0, 0), (0, 0), (0, 0), (0, KP1 - K * K)))
    block_b = _pick_block_b(B)
    Bp = ((B + block_b - 1) // block_b) * block_b
    if Bp != B:
        patches = jnp.pad(patches, ((0, Bp - B), (0, 0), (0, 0), (0, 0)))
    out = fused_forward(patches, packed, block_b)          # (Bp, 1, 1, 10)
    return out.reshape(Bp, -1)[:B]


# ------------------------------ test harness -------------------------------- #

def init_params(key):
    """Deterministic parameter init matching the PyTorch module's shapes."""
    ks = jax.random.split(key, 8)
    scale = 0.1
    return {
        "conv1_w": scale * jax.random.normal(ks[0], (10, 1, 5, 5), jnp.float32),
        "conv1_b": scale * jax.random.normal(ks[1], (10,), jnp.float32),
        "conv2_w": scale * jax.random.normal(ks[2], (20, 10, 5, 5), jnp.float32),
        "conv2_b": scale * jax.random.normal(ks[3], (20,), jnp.float32),
        "fc1_w": scale * jax.random.normal(ks[4], (50, 320), jnp.float32),
        "fc1_b": scale * jax.random.normal(ks[5], (50,), jnp.float32),
        "fc2_w": scale * jax.random.normal(ks[6], (10, 50), jnp.float32),
        "fc2_b": scale * jax.random.normal(ks[7], (10,), jnp.float32),
    }


def reference_forward(x, params):
    """Pure-JAX reference mirroring the PyTorch forward (for verification)."""
    dn = ("NCHW", "OIHW", "NCHW")
    y = jax.lax.conv_general_dilated(x, params["conv1_w"], (1, 1), "VALID",
                                     dimension_numbers=dn)
    y = jax.nn.relu(y + params["conv1_b"][None, :, None, None])
    y = jax.lax.conv_general_dilated(y, params["conv2_w"], (1, 1), "VALID",
                                     dimension_numbers=dn)
    y = jax.nn.relu(y + params["conv2_b"][None, :, None, None])
    y = y.reshape(-1, 320)
    y = jax.nn.relu(y @ params["fc1_w"].T + params["fc1_b"])
    y = y @ params["fc2_w"].T + params["fc2_b"]
    return y


if __name__ == "__main__":
    key = jax.random.PRNGKey(0)
    pkey, xkey = jax.random.split(key)
    params = init_params(pkey)
    packed = pack_params(params)                       # one-time repack
    x = jax.random.normal(xkey, (2, 1, 12, 12), jnp.float32)

    out = simple_model_forward(x, packed)
    out = jax.block_until_ready(out)
    assert out.shape == (2, 10), out.shape

    ref = reference_forward(x, params)
    np.testing.assert_allclose(np.asarray(out), np.asarray(ref),
                               rtol=1e-4, atol=1e-4)
    print("KERNEL_OK")
</pallas_src>

<mosaic_0001>
module attributes {stable_mosaic.version = 11 : i64} {
  func.func @fused_forward_kernel(%arg0: i32, %arg1: memref<1x8x8x32xf32, #tpu.memory_space<vmem>>, %arg2: memref<32x10xf32, #tpu.memory_space<vmem>>, %arg3: memref<1x1x1x10xf32, #tpu.memory_space<vmem>>, %arg4: memref<25x10x20xf32, #tpu.memory_space<vmem>>, %arg5: memref<1x1x1x20xf32, #tpu.memory_space<vmem>>, %arg6: memref<16x20x50xf32, #tpu.memory_space<vmem>>, %arg7: memref<1x1x1x50xf32, #tpu.memory_space<vmem>>, %arg8: memref<50x10xf32, #tpu.memory_space<vmem>>, %arg9: memref<1x1x1x10xf32, #tpu.memory_space<vmem>>, %arg10: memref<1x1x1x10xf32, #tpu.memory_space<vmem>>, %arg11: memref<1x8x8x10xf32, #tpu.memory_space<vmem>>, %arg12: memref<1x4x4x20xf32, #tpu.memory_space<vmem>>) attributes {dimension_semantics = [#tpu.dimension_semantics<parallel>], iteration_bounds = array<i64: 2>, scalar_prefetch = 0 : i64, scratch_operands = 2 : i64, tpu.core_type = #tpu.core_type<tc>, window_params = [{transform_indices = @transform_0, window_bounds = array<i64: 1, 8, 8, 32>}, {pipeline_mode = #tpu.pipeline_mode<synchronous>, transform_indices = @transform_1, window_bounds = array<i64: 32, 10>}, {pipeline_mode = #tpu.pipeline_mode<synchronous>, transform_indices = @transform_2, window_bounds = array<i64: 1, 1, 1, 10>}, {pipeline_mode = #tpu.pipeline_mode<synchronous>, transform_indices = @transform_3, window_bounds = array<i64: 25, 10, 20>}, {pipeline_mode = #tpu.pipeline_mode<synchronous>, transform_indices = @transform_4, window_bounds = array<i64: 1, 1, 1, 20>}, {pipeline_mode = #tpu.pipeline_mode<synchronous>, transform_indices = @transform_5, window_bounds = array<i64: 16, 20, 50>}, {pipeline_mode = #tpu.pipeline_mode<synchronous>, transform_indices = @transform_6, window_bounds = array<i64: 1, 1, 1, 50>}, {pipeline_mode = #tpu.pipeline_mode<synchronous>, transform_indices = @transform_7, window_bounds = array<i64: 50, 10>}, {pipeline_mode = #tpu.pipeline_mode<synchronous>, transform_indices = @transform_8, window_bounds = array<i64: 1, 1, 1, 10>}, {transform_indices = @transform_9, window_bounds = array<i64: 1, 1, 1, 10>}]} {
    %c0 = arith.constant 0 : index
    %c0_0 = arith.constant 0 : index
    %c0_1 = arith.constant 0 : index
    %c0_2 = arith.constant 0 : index
    %0 = vector.load %arg1[%c0, %c0_0, %c0_1, %c0_2] : memref<1x8x8x32xf32, #tpu.memory_space<vmem>>, vector<1x8x8x32xf32>
    %c0_3 = arith.constant 0 : index
    %c0_4 = arith.constant 0 : index
    %1 = vector.load %arg2[%c0_3, %c0_4] : memref<32x10xf32, #tpu.memory_space<vmem>>, vector<32x10xf32>
    %cst = arith.constant dense<0.000000e+00> : vector<1x8x8x10xf32>
    %2 = tpu.matmul %0, %1, %cst {dimension_numbers = #tpu.dot_dimension_numbers<[3], [0], [0, 1, 2], [1], [0, 0, 0, 1, 0, 2, 1, 1], [], []>} : vector<1x8x8x32xf32>, vector<32x10xf32>, vector<1x8x8x10xf32> -> vector<1x8x8x10xf32>
    %c0_5 = arith.constant 0 : index
    %c0_6 = arith.constant 0 : index
    %c0_7 = arith.constant 0 : index
    %c0_8 = arith.constant 0 : index
    %3 = vector.load %arg3[%c0_5, %c0_6, %c0_7, %c0_8] : memref<1x1x1x10xf32, #tpu.memory_space<vmem>>, vector<1x1x1x10xf32>
    %4 = vector.broadcast %3 : vector<1x1x1x10xf32> to vector<1x8x8x10xf32>
    %5 = arith.addf %2, %4 : vector<1x8x8x10xf32>
    %cst_9 = arith.constant 0.000000e+00 : f32
    %6 = vector.broadcast %cst_9 : f32 to vector<1x8x8x10xf32>
    %7 = arith.maximumf %5, %6 : vector<1x8x8x10xf32>
    %c0_10 = arith.constant 0 : index
    %c0_11 = arith.constant 0 : index
    %c0_12 = arith.constant 0 : index
    %c0_13 = arith.constant 0 : index
    %8 = vector.load %arg11[%c0_10, %c0_11, %c0_12, %c0_13] : memref<1x8x8x10xf32, #tpu.memory_space<vmem>>, vector<1x8x8x10xf32>
    tpu.vector_store %arg11[%c0_10, %c0_11, %c0_12, %c0_13], %7 {strides = array<i32>} : memref<1x8x8x10xf32, #tpu.memory_space<vmem>>, vector<1x8x8x10xf32>,
    %c0_14 = arith.constant 0 : index
    %c0_15 = arith.constant 0 : index
    %c0_16 = arith.constant 0 : index
    %c0_17 = arith.constant 0 : index
    %9 = vector.load %arg11[%c0_14, %c0_15, %c0_16, %c0_17] : memref<1x8x8x10xf32, #tpu.memory_space<vmem>>, vector<1x4x4x10xf32>
    %c0_18 = arith.constant 0 : index
    %c0_19 = arith.constant 0 : index
    %c0_20 = arith.constant 0 : index
    %10 = vector.load %arg4[%c0_18, %c0_19, %c0_20] : memref<25x10x20xf32, #tpu.memory_space<vmem>>, vector<1x10x20xf32>
    %11 = vector.shape_cast %10 : vector<1x10x20xf32> to vector<10x20xf32>
    %cst_21 = arith.constant dense<0.000000e+00> : vector<1x4x4x20xf32>
    %12 = tpu.matmul %9, %11, %cst_21 {dimension_numbers = #tpu.dot_dimension_numbers<[3], [0], [0, 1, 2], [1], [0, 0, 0, 1, 0, 2, 1, 1], [], []>} : vector<1x4x4x10xf32>, vector<10x20xf32>, vector<1x4x4x20xf32> -> vector<1x4x4x20xf32>
    %c0_22 = arith.constant 0 : index
    %c0_23 = arith.constant 0 : index
    %c1 = arith.constant 1 : index
    %c0_24 = arith.constant 0 : index
    %13 = vector.load %arg11[%c0_22, %c0_23, %c1, %c0_24] : memref<1x8x8x10xf32, #tpu.memory_space<vmem>>, vector<1x4x4x10xf32>
    %c1_25 = arith.constant 1 : index
    %c0_26 = arith.constant 0 : index
    %c0_27 = arith.constant 0 : index
    %14 = vector.load %arg4[%c1_25, %c0_26, %c0_27] : memref<25x10x20xf32, #tpu.memory_space<vmem>>, vector<1x10x20xf32>
    %15 = vector.shape_cast %14 : vector<1x10x20xf32> to vector<10x20xf32>
    %cst_28 = arith.constant dense<0.000000e+00> : vector<1x4x4x20xf32>
    %16 = tpu.matmul %13, %15, %cst_28 {dimension_numbers = #tpu.dot_dimension_numbers<[3], [0], [0, 1, 2], [1], [0, 0, 0, 1, 0, 2, 1, 1], [], []>} : vector<1x4x4x10xf32>, vector<10x20xf32>, vector<1x4x4x20xf32> -> vector<1x4x4x20xf32>
    %17 = arith.addf %12, %16 : vector<1x4x4x20xf32>
    %c0_29 = arith.constant 0 : index
    %c0_30 = arith.constant 0 : index
    %c2 = arith.constant 2 : index
    %c0_31 = arith.constant 0 : index
    %18 = vector.load %arg11[%c0_29, %c0_30, %c2, %c0_31] : memref<1x8x8x10xf32, #tpu.memory_space<vmem>>, vector<1x4x4x10xf32>
    %c2_32 = arith.constant 2 : index
    %c0_33 = arith.constant 0 : index
    %c0_34 = arith.constant 0 : index
    %19 = vector.load %arg4[%c2_32, %c0_33, %c0_34] : memref<25x10x20xf32, #tpu.memory_space<vmem>>, vector<1x10x20xf32>
    %20 = vector.shape_cast %19 : vector<1x10x20xf32> to vector<10x20xf32>
    %cst_35 = arith.constant dense<0.000000e+00> : vector<1x4x4x20xf32>
    %21 = tpu.matmul %18, %20, %cst_35 {dimension_numbers = #tpu.dot_dimension_numbers<[3], [0], [0, 1, 2], [1], [0, 0, 0, 1, 0, 2, 1, 1], [], []>} : vector<1x4x4x10xf32>, vector<10x20xf32>, vector<1x4x4x20xf32> -> vector<1x4x4x20xf32>
    %22 = arith.addf %17, %21 : vector<1x4x4x20xf32>
    %c0_36 = arith.constant 0 : index
    %c0_37 = arith.constant 0 : index
    %c3 = arith.constant 3 : index
    %c0_38 = arith.constant 0 : index
    %23 = vector.load %arg11[%c0_36, %c0_37, %c3, %c0_38] : memref<1x8x8x10xf32, #tpu.memory_space<vmem>>, vector<1x4x4x10xf32>
    %c3_39 = arith.constant 3 : index
    %c0_40 = arith.constant 0 : index
    %c0_41 = arith.constant 0 : index
    %24 = vector.load %arg4[%c3_39, %c0_40, %c0_41] : memref<25x10x20xf32, #tpu.memory_space<vmem>>, vector<1x10x20xf32>
    %25 = vector.shape_cast %24 : vector<1x10x20xf32> to vector<10x20xf32>
    %cst_42 = arith.constant dense<0.000000e+00> : vector<1x4x4x20xf32>
    %26 = tpu.matmul %23, %25, %cst_42 {dimension_numbers = #tpu.dot_dimension_numbers<[3], [0], [0, 1, 2], [1], [0, 0, 0, 1, 0, 2, 1, 1], [], []>} : vector<1x4x4x10xf32>, vector<10x20xf32>, vector<1x4x4x20xf32> -> vector<1x4x4x20xf32>
    %27 = arith.addf %22, %26 : vector<1x4x4x20xf32>
    %c0_43 = arith.constant 0 : index
    %c0_44 = arith.constant 0 : index
    %c4 = arith.constant 4 : index
    %c0_45 = arith.constant 0 : index
    %28 = vector.load %arg11[%c0_43, %c0_44, %c4, %c0_45] : memref<1x8x8x10xf32, #tpu.memory_space<vmem>>, vector<1x4x4x10xf32>
    %c4_46 = arith.constant 4 : index
    %c0_47 = arith.constant 0 : index
    %c0_48 = arith.constant 0 : index
    %29 = vector.load %arg4[%c4_46, %c0_47, %c0_48] : memref<25x10x20xf32, #tpu.memory_space<vmem>>, vector<1x10x20xf32>
    %30 = vector.shape_cast %29 : vector<1x10x20xf32> to vector<10x20xf32>
    %cst_49 = arith.constant dense<0.000000e+00> : vector<1x4x4x20xf32>
    %31 = tpu.matmul %28, %30, %cst_49 {dimension_numbers = #tpu.dot_dimension_numbers<[3], [0], [0, 1, 2], [1], [0, 0, 0, 1, 0, 2, 1, 1], [], []>} : vector<1x4x4x10xf32>, vector<10x20xf32>, vector<1x4x4x20xf32> -> vector<1x4x4x20xf32>
    %32 = arith.addf %27, %31 : vector<1x4x4x20xf32>
    %c0_50 = arith.constant 0 : index
    %c1_51 = arith.constant 1 : index
    %c0_52 = arith.constant 0 : index
    %c0_53 = arith.constant 0 : index
    %33 = vector.load %arg11[%c0_50, %c1_51, %c0_52, %c0_53] : memref<1x8x8x10xf32, #tpu.memory_space<vmem>>, vector<1x4x4x10xf32>
    %c5 = arith.constant 5 : index
    %c0_54 = arith.constant 0 : index
    %c0_55 = arith.constant 0 : index
    %34 = vector.load %arg4[%c5, %c0_54, %c0_55] : memref<25x10x20xf32, #tpu.memory_space<vmem>>, vector<1x10x20xf32>
    %35 = vector.shape_cast %34 : vector<1x10x20xf32> to vector<10x20xf32>
    %cst_56 = arith.constant dense<0.000000e+00> : vector<1x4x4x20xf32>
    %36 = tpu.matmul %33, %35, %cst_56 {dimension_numbers = #tpu.dot_dimension_numbers<[3], [0], [0, 1, 2], [1], [0, 0, 0, 1, 0, 2, 1, 1], [], []>} : vector<1x4x4x10xf32>, vector<10x20xf32>, vector<1x4x4x20xf32> -> vector<1x4x4x20xf32>
    %37 = arith.addf %32, %36 : vector<1x4x4x20xf32>
    %c0_57 = arith.constant 0 : index
    %c1_58 = arith.constant 1 : index
    %c1_59 = arith.constant 1 : index
    %c0_60 = arith.constant 0 : index
    %38 = vector.load %arg11[%c0_57, %c1_58, %c1_59, %c0_60] : memref<1x8x8x10xf32, #tpu.memory_space<vmem>>, vector<1x4x4x10xf32>
    %c6 = arith.constant 6 : index
    %c0_61 = arith.constant 0 : index
    %c0_62 = arith.constant 0 : index
    %39 = vector.load %arg4[%c6, %c0_61, %c0_62] : memref<25x10x20xf32, #tpu.memory_space<vmem>>, vector<1x10x20xf32>
    %40 = vector.shape_cast %39 : vector<1x10x20xf32> to vector<10x20xf32>
    %cst_63 = arith.constant dense<0.000000e+00> : vector<1x4x4x20xf32>
    %41 = tpu.matmul %38, %40, %cst_63 {dimension_numbers = #tpu.dot_dimension_numbers<[3], [0], [0, 1, 2], [1], [0, 0, 0, 1, 0, 2, 1, 1], [], []>} : vector<1x4x4x10xf32>, vector<10x20xf32>, vector<1x4x4x20xf32> -> vector<1x4x4x20xf32>
    %42 = arith.addf %37, %41 : vector<1x4x4x20xf32>
    %c0_64 = arith.constant 0 : index
    %c1_65 = arith.constant 1 : index
    %c2_66 = arith.constant 2 : index
    %c0_67 = arith.constant 0 : index
    %43 = vector.load %arg11[%c0_64, %c1_65, %c2_66, %c0_67] : memref<1x8x8x10xf32, #tpu.memory_space<vmem>>, vector<1x4x4x10xf32>
    %c7 = arith.constant 7 : index
    %c0_68 = arith.constant 0 : index
    %c0_69 = arith.constant 0 : index
    %44 = vector.load %arg4[%c7, %c0_68, %c0_69] : memref<25x10x20xf32, #tpu.memory_space<vmem>>, vector<1x10x20xf32>
    %45 = vector.shape_cast %44 : vector<1x10x20xf32> to vector<10x20xf32>
    %cst_70 = arith.constant dense<0.000000e+00> : vector<1x4x4x20xf32>
    %46 = tpu.matmul %43, %45, %cst_70 {dimension_numbers = #tpu.dot_dimension_numbers<[3], [0], [0, 1, 2], [1], [0, 0, 0, 1, 0, 2, 1, 1], [], []>} : vector<1x4x4x10xf32>, vector<10x20xf32>, vector<1x4x4x20xf32> -> vector<1x4x4x20xf32>
    %47 = arith.addf %42, %46 : vector<1x4x4x20xf32>
    %c0_71 = arith.constant 0 : index
    %c1_72 = arith.constant 1 : index
    %c3_73 = arith.constant 3 : index
    %c0_74 = arith.constant 0 : index
    %48 = vector.load %arg11[%c0_71, %c1_72, %c3_73, %c0_74] : memref<1x8x8x10xf32, #tpu.memory_space<vmem>>, vector<1x4x4x10xf32>
    %c8 = arith.constant 8 : index
    %c0_75 = arith.constant 0 : index
    %c0_76 = arith.constant 0 : index
    %49 = vector.load %arg4[%c8, %c0_75, %c0_76] : memref<25x10x20xf32, #tpu.memory_space<vmem>>, vector<1x10x20xf32>
    %50 = vector.shape_cast %49 : vector<1x10x20xf32> to vector<10x20xf32>
    %cst_77 = arith.constant dense<0.000000e+00> : vector<1x4x4x20xf32>
    %51 = tpu.matmul %48, %50, %cst_77 {dimension_numbers = #tpu.dot_dimension_numbers<[3], [0], [0, 1, 2], [1], [0, 0, 0, 1, 0, 2, 1, 1], [], []>} : vector<1x4x4x10xf32>, vector<10x20xf32>, vector<1x4x4x20xf32> -> vector<1x4x4x20xf32>
    %52 = arith.addf %47, %51 : vector<1x4x4x20xf32>
    %c0_78 = arith.constant 0 : index
    %c1_79 = arith.constant 1 : index
    %c4_80 = arith.constant 4 : index
    %c0_81 = arith.constant 0 : index
    %53 = vector.load %arg11[%c0_78, %c1_79, %c4_80, %c0_81] : memref<1x8x8x10xf32, #tpu.memory_space<vmem>>, vector<1x4x4x10xf32>
    %c9 = arith.constant 9 : index
    %c0_82 = arith.constant 0 : index
    %c0_83 = arith.constant 0 : index
    %54 = vector.load %arg4[%c9, %c0_82, %c0_83] : memref<25x10x20xf32, #tpu.memory_space<vmem>>, vector<1x10x20xf32>
    %55 = vector.shape_cast %54 : vector<1x10x20xf32> to vector<10x20xf32>
    %cst_84 = arith.constant dense<0.000000e+00> : vector<1x4x4x20xf32>
    %56 = tpu.matmul %53, %55, %cst_84 {dimension_numbers = #tpu.dot_dimension_numbers<[3], [0], [0, 1, 2], [1], [0, 0, 0, 1, 0, 2, 1, 1], [], []>} : vector<1x4x4x10xf32>, vector<10x20xf32>, vector<1x4x4x20xf32> -> vector<1x4x4x20xf32>
    %57 = arith.addf %52, %56 : vector<1x4x4x20xf32>
    %c0_85 = arith.constant 0 : index
    %c2_86 = arith.constant 2 : index
    %c0_87 = arith.constant 0 : index
    %c0_88 = arith.constant 0 : index
    %58 = vector.load %arg11[%c0_85, %c2_86, %c0_87, %c0_88] : memref<1x8x8x10xf32, #tpu.memory_space<vmem>>, vector<1x4x4x10xf32>
    %c10 = arith.constant 10 : index
    %c0_89 = arith.constant 0 : index
    %c0_90 = arith.constant 0 : index
    %59 = vector.load %arg4[%c10, %c0_89, %c0_90] : memref<25x10x20xf32, #tpu.memory_space<vmem>>, vector<1x10x20xf32>
    %60 = vector.shape_cast %59 : vector<1x10x20xf32> to vector<10x20xf32>
    %cst_91 = arith.constant dense<0.000000e+00> : vector<1x4x4x20xf32>
    %61 = tpu.matmul %58, %60, %cst_91 {dimension_numbers = #tpu.dot_dimension_numbers<[3], [0], [0, 1, 2], [1], [0, 0, 0, 1, 0, 2, 1, 1], [], []>} : vector<1x4x4x10xf32>, vector<10x20xf32>, vector<1x4x4x20xf32> -> vector<1x4x4x20xf32>
    %62 = arith.addf %57, %61 : vector<1x4x4x20xf32>
    %c0_92 = arith.constant 0 : index
    %c2_93 = arith.constant 2 : index
    %c1_94 = arith.constant 1 : index
    %c0_95 = arith.constant 0 : index
    %63 = vector.load %arg11[%c0_92, %c2_93, %c1_94, %c0_95] : memref<1x8x8x10xf32, #tpu.memory_space<vmem>>, vector<1x4x4x10xf32>
    %c11 = arith.constant 11 : index
    %c0_96 = arith.constant 0 : index
    %c0_97 = arith.constant 0 : index
    %64 = vector.load %arg4[%c11, %c0_96, %c0_97] : memref<25x10x20xf32, #tpu.memory_space<vmem>>, vector<1x10x20xf32>
    %65 = vector.shape_cast %64 : vector<1x10x20xf32> to vector<10x20xf32>
    %cst_98 = arith.constant dense<0.000000e+00> : vector<1x4x4x20xf32>
    %66 = tpu.matmul %63, %65, %cst_98 {dimension_numbers = #tpu.dot_dimension_numbers<[3], [0], [0, 1, 2], [1], [0, 0, 0, 1, 0, 2, 1, 1], [], []>} : vector<1x4x4x10xf32>, vector<10x20xf32>, vector<1x4x4x20xf32> -> vector<1x4x4x20xf32>
    %67 = arith.addf %62, %66 : vector<1x4x4x20xf32>
    %c0_99 = arith.constant 0 : index
    %c2_100 = arith.constant 2 : index
    %c2_101 = arith.constant 2 : index
    %c0_102 = arith.constant 0 : index
    %68 = vector.load %arg11[%c0_99, %c2_100, %c2_101, %c0_102] : memref<1x8x8x10xf32, #tpu.memory_space<vmem>>, vector<1x4x4x10xf32>
    %c12 = arith.constant 12 : index
    %c0_103 = arith.constant 0 : index
    %c0_104 = arith.constant 0 : index
    %69 = vector.load %arg4[%c12, %c0_103, %c0_104] : memref<25x10x20xf32, #tpu.memory_space<vmem>>, vector<1x10x20xf32>
    %70 = vector.shape_cast %69 : vector<1x10x20xf32> to vector<10x20xf32>
    %cst_105 = arith.constant dense<0.000000e+00> : vector<1x4x4x20xf32>
    %71 = tpu.matmul %68, %70, %cst_105 {dimension_numbers = #tpu.dot_dimension_numbers<[3], [0], [0, 1, 2], [1], [0, 0, 0, 1, 0, 2, 1, 1], [], []>} : vector<1x4x4x10xf32>, vector<10x20xf32>, vector<1x4x4x20xf32> -> vector<1x4x4x20xf32>
    %72 = arith.addf %67, %71 : vector<1x4x4x20xf32>
    %c0_106 = arith.constant 0 : index
    %c2_107 = arith.constant 2 : index
    %c3_108 = arith.constant 3 : index
    %c0_109 = arith.constant 0 : index
    %73 = vector.load %arg11[%c0_106, %c2_107, %c3_108, %c0_109] : memref<1x8x8x10xf32, #tpu.memory_space<vmem>>, vector<1x4x4x10xf32>
    %c13 = arith.constant 13 : index
    %c0_110 = arith.constant 0 : index
    %c0_111 = arith.constant 0 : index
    %74 = vector.load %arg4[%c13, %c0_110, %c0_111] : memref<25x10x20xf32, #tpu.memory_space<vmem>>, vector<1x10x20xf32>
    %75 = vector.shape_cast %74 : vector<1x10x20xf32> to vector<10x20xf32>
    %cst_112 = arith.constant dense<0.000000e+00> : vector<1x4x4x20xf32>
    %76 = tpu.matmul %73, %75, %cst_112 {dimension_numbers = #tpu.dot_dimension_numbers<[3], [0], [0, 1, 2], [1], [0, 0, 0, 1, 0, 2, 1, 1], [], []>} : vector<1x4x4x10xf32>, vector<10x20xf32>, vector<1x4x4x20xf32> -> vector<1x4x4x20xf32>
    %77 = arith.addf %72, %76 : vector<1x4x4x20xf32>
    %c0_113 = arith.constant 0 : index
    %c2_114 = arith.constant 2 : index
    %c4_115 = arith.constant 4 : index
    %c0_116 = arith.constant 0 : index
    %78 = vector.load %arg11[%c0_113, %c2_114, %c4_115, %c0_116] : memref<1x8x8x10xf32, #tpu.memory_space<vmem>>, vector<1x4x4x10xf32>
    %c14 = arith.constant 14 : index
    %c0_117 = arith.constant 0 : index
    %c0_118 = arith.constant 0 : index
    %79 = vector.load %arg4[%c14, %c0_117, %c0_118] : memref<25x10x20xf32, #tpu.memory_space<vmem>>, vector<1x10x20xf32>
    %80 = vector.shape_cast %79 : vector<1x10x20xf32> to vector<10x20xf32>
    %cst_119 = arith.constant dense<0.000000e+00> : vector<1x4x4x20xf32>
    %81 = tpu.matmul %78, %80, %cst_119 {dimension_numbers = #tpu.dot_dimension_numbers<[3], [0], [0, 1, 2], [1], [0, 0, 0, 1, 0, 2, 1, 1], [], []>} : vector<1x4x4x10xf32>, vector<10x20xf32>, vector<1x4x4x20xf32> -> vector<1x4x4x20xf32>
    %82 = arith.addf %77, %81 : vector<1x4x4x20xf32>
    %c0_120 = arith.constant 0 : index
    %c3_121 = arith.constant 3 : index
    %c0_122 = arith.constant 0 : index
    %c0_123 = arith.constant 0 : index
    %83 = vector.load %arg11[%c0_120, %c3_121, %c0_122, %c0_123] : memref<1x8x8x10xf32, #tpu.memory_space<vmem>>, vector<1x4x4x10xf32>
    %c15 = arith.constant 15 : index
    %c0_124 = arith.constant 0 : index
    %c0_125 = arith.constant 0 : index
    %84 = vector.load %arg4[%c15, %c0_124, %c0_125] : memref<25x10x20xf32, #tpu.memory_space<vmem>>, vector<1x10x20xf32>
    %85 = vector.shape_cast %84 : vector<1x10x20xf32> to vector<10x20xf32>
    %cst_126 = arith.constant dense<0.000000e+00> : vector<1x4x4x20xf32>
    %86 = tpu.matmul %83, %85, %cst_126 {dimension_numbers = #tpu.dot_dimension_numbers<[3], [0], [0, 1, 2], [1], [0, 0, 0, 1, 0, 2, 1, 1], [], []>} : vector<1x4x4x10xf32>, vector<10x20xf32>, vector<1x4x4x20xf32> -> vector<1x4x4x20xf32>
    %87 = arith.addf %82, %86 : vector<1x4x4x20xf32>
    %c0_127 = arith.constant 0 : index
    %c3_128 = arith.constant 3 : index
    %c1_129 = arith.constant 1 : index
    %c0_130 = arith.constant 0 : index
    %88 = vector.load %arg11[%c0_127, %c3_128, %c1_129, %c0_130] : memref<1x8x8x10xf32, #tpu.memory_space<vmem>>, vector<1x4x4x10xf32>
    %c16 = arith.constant 16 : index
    %c0_131 = arith.constant 0 : index
    %c0_132 = arith.constant 0 : index
    %89 = vector.load %arg4[%c16, %c0_131, %c0_132] : memref<25x10x20xf32, #tpu.memory_space<vmem>>, vector<1x10x20xf32>
    %90 = vector.shape_cast %89 : vector<1x10x20xf32> to vector<10x20xf32>
    %cst_133 = arith.constant dense<0.000000e+00> : vector<1x4x4x20xf32>
    %91 = tpu.matmul %88, %90, %cst_133 {dimension_numbers = #tpu.dot_dimension_numbers<[3], [0], [0, 1, 2], [1], [0, 0, 0, 1, 0, 2, 1, 1], [], []>} : vector<1x4x4x10xf32>, vector<10x20xf32>, vector<1x4x4x20xf32> -> vector<1x4x4x20xf32>
    %92 = arith.addf %87, %91 : vector<1x4x4x20xf32>
    %c0_134 = arith.constant 0 : index
    %c3_135 = arith.constant 3 : index
    %c2_136 = arith.constant 2 : index
    %c0_137 = arith.constant 0 : index
    %93 = vector.load %arg11[%c0_134, %c3_135, %c2_136, %c0_137] : memref<1x8x8x10xf32, #tpu.memory_space<vmem>>, vector<1x4x4x10xf32>
    %c17 = arith.constant 17 : index
    %c0_138 = arith.constant 0 : index
    %c0_139 = arith.constant 0 : index
    %94 = vector.load %arg4[%c17, %c0_138, %c0_139] : memref<25x10x20xf32, #tpu.memory_space<vmem>>, vector<1x10x20xf32>
    %95 = vector.shape_cast %94 : vector<1x10x20xf32> to vector<10x20xf32>
    %cst_140 = arith.constant dense<0.000000e+00> : vector<1x4x4x20xf32>
    %96 = tpu.matmul %93, %95, %cst_140 {dimension_numbers = #tpu.dot_dimension_numbers<[3], [0], [0, 1, 2], [1], [0, 0, 0, 1, 0, 2, 1, 1], [], []>} : vector<1x4x4x10xf32>, vector<10x20xf32>, vector<1x4x4x20xf32> -> vector<1x4x4x20xf32>
    %97 = arith.addf %92, %96 : vector<1x4x4x20xf32>
    %c0_141 = arith.constant 0 : index
    %c3_142 = arith.constant 3 : index
    %c3_143 = arith.constant 3 : index
    %c0_144 = arith.constant 0 : index
    %98 = vector.load %arg11[%c0_141, %c3_142, %c3_143, %c0_144] : memref<1x8x8x10xf32, #tpu.memory_space<vmem>>, vector<1x4x4x10xf32>
    %c18 = arith.constant 18 : index
    %c0_145 = arith.constant 0 : index
    %c0_146 = arith.constant 0 : index
    %99 = vector.load %arg4[%c18, %c0_145, %c0_146] : memref<25x10x20xf32, #tpu.memory_space<vmem>>, vector<1x10x20xf32>
    %100 = vector.shape_cast %99 : vector<1x10x20xf32> to vector<10x20xf32>
    %cst_147 = arith.constant dense<0.000000e+00> : vector<1x4x4x20xf32>
    %101 = tpu.matmul %98, %100, %cst_147 {dimension_numbers = #tpu.dot_dimension_numbers<[3], [0], [0, 1, 2], [1], [0, 0, 0, 1, 0, 2, 1, 1], [], []>} : vector<1x4x4x10xf32>, vector<10x20xf32>, vector<1x4x4x20xf32> -> vector<1x4x4x20xf32>
    %102 = arith.addf %97, %101 : vector<1x4x4x20xf32>
    %c0_148 = arith.constant 0 : index
    %c3_149 = arith.constant 3 : index
    %c4_150 = arith.constant 4 : index
    %c0_151 = arith.constant 0 : index
    %103 = vector.load %arg11[%c0_148, %c3_149, %c4_150, %c0_151] : memref<1x8x8x10xf32, #tpu.memory_space<vmem>>, vector<1x4x4x10xf32>
    %c19 = arith.constant 19 : index
    %c0_152 = arith.constant 0 : index
    %c0_153 = arith.constant 0 : index
    %104 = vector.load %arg4[%c19, %c0_152, %c0_153] : memref<25x10x20xf32, #tpu.memory_space<vmem>>, vector<1x10x20xf32>
    %105 = vector.shape_cast %104 : vector<1x10x20xf32> to vector<10x20xf32>
    %cst_154 = arith.constant dense<0.000000e+00> : vector<1x4x4x20xf32>
    %106 = tpu.matmul %103, %105, %cst_154 {dimension_numbers = #tpu.dot_dimension_numbers<[3], [0], [0, 1, 2], [1], [0, 0, 0, 1, 0, 2, 1, 1], [], []>} : vector<1x4x4x10xf32>, vector<10x20xf32>, vector<1x4x4x20xf32> -> vector<1x4x4x20xf32>
    %107 = arith.addf %102, %106 : vector<1x4x4x20xf32>
    %c0_155 = arith.constant 0 : index
    %c4_156 = arith.constant 4 : index
    %c0_157 = arith.constant 0 : index
    %c0_158 = arith.constant 0 : index
    %108 = vector.load %arg11[%c0_155, %c4_156, %c0_157, %c0_158] : memref<1x8x8x10xf32, #tpu.memory_space<vmem>>, vector<1x4x4x10xf32>
    %c20 = arith.constant 20 : index
    %c0_159 = arith.constant 0 : index
    %c0_160 = arith.constant 0 : index
    %109 = vector.load %arg4[%c20, %c0_159, %c0_160] : memref<25x10x20xf32, #tpu.memory_space<vmem>>, vector<1x10x20xf32>
    %110 = vector.shape_cast %109 : vector<1x10x20xf32> to vector<10x20xf32>
    %cst_161 = arith.constant dense<0.000000e+00> : vector<1x4x4x20xf32>
    %111 = tpu.matmul %108, %110, %cst_161 {dimension_numbers = #tpu.dot_dimension_numbers<[3], [0], [0, 1, 2], [1], [0, 0, 0, 1, 0, 2, 1, 1], [], []>} : vector<1x4x4x10xf32>, vector<10x20xf32>, vector<1x4x4x20xf32> -> vector<1x4x4x20xf32>
    %112 = arith.addf %107, %111 : vector<1x4x4x20xf32>
    %c0_162 = arith.constant 0 : index
    %c4_163 = arith.constant 4 : index
    %c1_164 = arith.constant 1 : index
    %c0_165 = arith.constant 0 : index
    %113 = vector.load %arg11[%c0_162, %c4_163, %c1_164, %c0_165] : memref<1x8x8x10xf32, #tpu.memory_space<vmem>>, vector<1x4x4x10xf32>
    %c21 = arith.constant 21 : index
    %c0_166 = arith.constant 0 : index
    %c0_167 = arith.constant 0 : index
    %114 = vector.load %arg4[%c21, %c0_166, %c0_167] : memref<25x10x20xf32, #tpu.memory_space<vmem>>, vector<1x10x20xf32>
    %115 = vector.shape_cast %114 : vector<1x10x20xf32> to vector<10x20xf32>
    %cst_168 = arith.constant dense<0.000000e+00> : vector<1x4x4x20xf32>
    %116 = tpu.matmul %113, %115, %cst_168 {dimension_numbers = #tpu.dot_dimension_numbers<[3], [0], [0, 1, 2], [1], [0, 0, 0, 1, 0, 2, 1, 1], [], []>} : vector<1x4x4x10xf32>, vector<10x20xf32>, vector<1x4x4x20xf32> -> vector<1x4x4x20xf32>
    %117 = arith.addf %112, %116 : vector<1x4x4x20xf32>
    %c0_169 = arith.constant 0 : index
    %c4_170 = arith.constant 4 : index
    %c2_171 = arith.constant 2 : index
    %c0_172 = arith.constant 0 : index
    %118 = vector.load %arg11[%c0_169, %c4_170, %c2_171, %c0_172] : memref<1x8x8x10xf32, #tpu.memory_space<vmem>>, vector<1x4x4x10xf32>
    %c22 = arith.constant 22 : index
    %c0_173 = arith.constant 0 : index
    %c0_174 = arith.constant 0 : index
    %119 = vector.load %arg4[%c22, %c0_173, %c0_174] : memref<25x10x20xf32, #tpu.memory_space<vmem>>, vector<1x10x20xf32>
    %120 = vector.shape_cast %119 : vector<1x10x20xf32> to vector<10x20xf32>
    %cst_175 = arith.constant dense<0.000000e+00> : vector<1x4x4x20xf32>
    %121 = tpu.matmul %118, %120, %cst_175 {dimension_numbers = #tpu.dot_dimension_numbers<[3], [0], [0, 1, 2], [1], [0, 0, 0, 1, 0, 2, 1, 1], [], []>} : vector<1x4x4x10xf32>, vector<10x20xf32>, vector<1x4x4x20xf32> -> vector<1x4x4x20xf32>
    %122 = arith.addf %117, %121 : vector<1x4x4x20xf32>
    %c0_176 = arith.constant 0 : index
    %c4_177 = arith.constant 4 : index
    %c3_178 = arith.constant 3 : index
    %c0_179 = arith.constant 0 : index
    %123 = vector.load %arg11[%c0_176, %c4_177, %c3_178, %c0_179] : memref<1x8x8x10xf32, #tpu.memory_space<vmem>>, vector<1x4x4x10xf32>
    %c23 = arith.constant 23 : index
    %c0_180 = arith.constant 0 : index
    %c0_181 = arith.constant 0 : index
    %124 = vector.load %arg4[%c23, %c0_180, %c0_181] : memref<25x10x20xf32, #tpu.memory_space<vmem>>, vector<1x10x20xf32>
    %125 = vector.shape_cast %124 : vector<1x10x20xf32> to vector<10x20xf32>
    %cst_182 = arith.constant dense<0.000000e+00> : vector<1x4x4x20xf32>
    %126 = tpu.matmul %123, %125, %cst_182 {dimension_numbers = #tpu.dot_dimension_numbers<[3], [0], [0, 1, 2], [1], [0, 0, 0, 1, 0, 2, 1, 1], [], []>} : vector<1x4x4x10xf32>, vector<10x20xf32>, vector<1x4x4x20xf32> -> vector<1x4x4x20xf32>
    %127 = arith.addf %122, %126 : vector<1x4x4x20xf32>
    %c0_183 = arith.constant 0 : index
    %c4_184 = arith.constant 4 : index
    %c4_185 = arith.constant 4 : index
    %c0_186 = arith.constant 0 : index
    %128 = vector.load %arg11[%c0_183, %c4_184, %c4_185, %c0_186] : memref<1x8x8x10xf32, #tpu.memory_space<vmem>>, vector<1x4x4x10xf32>
    %c24 = arith.constant 24 : index
    %c0_187 = arith.constant 0 : index
    %c0_188 = arith.constant 0 : index
    %129 = vector.load %arg4[%c24, %c0_187, %c0_188] : memref<25x10x20xf32, #tpu.memory_space<vmem>>, vector<1x10x20xf32>
    %130 = vector.shape_cast %129 : vector<1x10x20xf32> to vector<10x20xf32>
    %cst_189 = arith.constant dense<0.000000e+00> : vector<1x4x4x20xf32>
    %131 = tpu.matmul %128, %130, %cst_189 {dimension_numbers = #tpu.dot_dimension_numbers<[3], [0], [0, 1, 2], [1], [0, 0, 0, 1, 0, 2, 1, 1], [], []>} : vector<1x4x4x10xf32>, vector<10x20xf32>, vector<1x4x4x20xf32> -> vector<1x4x4x20xf32>
    %132 = arith.addf %127, %131 : vector<1x4x4x20xf32>
    %c0_190 = arith.constant 0 : index
    %c0_191 = arith.constant 0 : index
    %c0_192 = arith.constant 0 : index
    %c0_193 = arith.constant 0 : index
    %133 = vector.load %arg5[%c0_190, %c0_191, %c0_192, %c0_193] : memref<1x1x1x20xf32, #tpu.memory_space<vmem>>, vector<1x1x1x20xf32>
    %134 = vector.broadcast %133 : vector<1x1x1x20xf32> to vector<1x4x4x20xf32>
    %135 = arith.addf %132, %134 : vector<1x4x4x20xf32>
    %cst_194 = arith.constant 0.000000e+00 : f32
    %136 = vector.broadcast %cst_194 : f32 to vector<1x4x4x20xf32>
    %137 = arith.maximumf %135, %136 : vector<1x4x4x20xf32>
    %c0_195 = arith.constant 0 : index
    %c0_196 = arith.constant 0 : index
    %c0_197 = arith.constant 0 : index
    %c0_198 = arith.constant 0 : index
    %138 = vector.load %arg12[%c0_195, %c0_196, %c0_197, %c0_198] : memref<1x4x4x20xf32, #tpu.memory_space<vmem>>, vector<1x4x4x20xf32>
    tpu.vector_store %arg12[%c0_195, %c0_196, %c0_197, %c0_198], %137 {strides = array<i32>} : memref<1x4x4x20xf32, #tpu.memory_space<vmem>>, vector<1x4x4x20xf32>,
    %c0_199 = arith.constant 0 : index
    %c0_200 = arith.constant 0 : index
    %c0_201 = arith.constant 0 : index
    %c0_202 = arith.constant 0 : index
    %139 = vector.load %arg12[%c0_199, %c0_200, %c0_201, %c0_202] : memref<1x4x4x20xf32, #tpu.memory_space<vmem>>, vector<1x1x1x20xf32>
    %c0_203 = arith.constant 0 : index
    %c0_204 = arith.constant 0 : index
    %c0_205 = arith.constant 0 : index
    %140 = vector.load %arg6[%c0_203, %c0_204, %c0_205] : memref<16x20x50xf32, #tpu.memory_space<vmem>>, vector<1x20x50xf32>
    %141 = vector.shape_cast %140 : vector<1x20x50xf32> to vector<20x50xf32>
    %cst_206 = arith.constant dense<0.000000e+00> : vector<1x1x1x50xf32>
    %142 = tpu.matmul %139, %141, %cst_206 {dimension_numbers = #tpu.dot_dimension_numbers<[3], [0], [0, 1, 2], [1], [0, 0, 0, 1, 0, 2, 1, 1], [], []>} : vector<1x1x1x20xf32>, vector<20x50xf32>, vector<1x1x1x50xf32> -> vector<1x1x1x50xf32>
    %c0_207 = arith.constant 0 : index
    %c0_208 = arith.constant 0 : index
    %c1_209 = arith.constant 1 : index
    %c0_210 = arith.constant 0 : index
    %143 = vector.load %arg12[%c0_207, %c0_208, %c1_209, %c0_210] : memref<1x4x4x20xf32, #tpu.memory_space<vmem>>, vector<1x1x1x20xf32>
    %c1_211 = arith.constant 1 : index
    %c0_212 = arith.constant 0 : index
    %c0_213 = arith.constant 0 : index
    %144 = vector.load %arg6[%c1_211, %c0_212, %c0_213] : memref<16x20x50xf32, #tpu.memory_space<vmem>>, vector<1x20x50xf32>
    %145 = vector.shape_cast %144 : vector<1x20x50xf32> to vector<20x50xf32>
    %cst_214 = arith.constant dense<0.000000e+00> : vector<1x1x1x50xf32>
    %146 = tpu.matmul %143, %145, %cst_214 {dimension_numbers = #tpu.dot_dimension_numbers<[3], [0], [0, 1, 2], [1], [0, 0, 0, 1, 0, 2, 1, 1], [], []>} : vector<1x1x1x20xf32>, vector<20x50xf32>, vector<1x1x1x50xf32> -> vector<1x1x1x50xf32>
    %147 = arith.addf %142, %146 : vector<1x1x1x50xf32>
    %c0_215 = arith.constant 0 : index
    %c0_216 = arith.constant 0 : index
    %c2_217 = arith.constant 2 : index
    %c0_218 = arith.constant 0 : index
    %148 = vector.load %arg12[%c0_215, %c0_216, %c2_217, %c0_218] : memref<1x4x4x20xf32, #tpu.memory_space<vmem>>, vector<1x1x1x20xf32>
    %c2_219 = arith.constant 2 : index
    %c0_220 = arith.constant 0 : index
    %c0_221 = arith.constant 0 : index
    %149 = vector.load %arg6[%c2_219, %c0_220, %c0_221] : memref<16x20x50xf32, #tpu.memory_space<vmem>>, vector<1x20x50xf32>
    %150 = vector.shape_cast %149 : vector<1x20x50xf32> to vector<20x50xf32>
    %cst_222 = arith.constant dense<0.000000e+00> : vector<1x1x1x50xf32>
    %151 = tpu.matmul %148, %150, %cst_222 {dimension_numbers = #tpu.dot_dimension_numbers<[3], [0], [0, 1, 2], [1], [0, 0, 0, 1, 0, 2, 1, 1], [], []>} : vector<1x1x1x20xf32>, vector<20x50xf32>, vector<1x1x1x50xf32> -> vector<1x1x1x50xf32>
    %152 = arith.addf %147, %151 : vector<1x1x1x50xf32>
    %c0_223 = arith.constant 0 : index
    %c0_224 = arith.constant 0 : index
    %c3_225 = arith.constant 3 : index
    %c0_226 = arith.constant 0 : index
    %153 = vector.load %arg12[%c0_223, %c0_224, %c3_225, %c0_226] : memref<1x4x4x20xf32, #tpu.memory_space<vmem>>, vector<1x1x1x20xf32>
    %c3_227 = arith.constant 3 : index
    %c0_228 = arith.constant 0 : index
    %c0_229 = arith.constant 0 : index
    %154 = vector.load %arg6[%c3_227, %c0_228, %c0_229] : memref<16x20x50xf32, #tpu.memory_space<vmem>>, vector<1x20x50xf32>
    %155 = vector.shape_cast %154 : vector<1x20x50xf32> to vector<20x50xf32>
    %cst_230 = arith.constant dense<0.000000e+00> : vector<1x1x1x50xf32>
    %156 = tpu.matmul %153, %155, %cst_230 {dimension_numbers = #tpu.dot_dimension_numbers<[3], [0], [0, 1, 2], [1], [0, 0, 0, 1, 0, 2, 1, 1], [], []>} : vector<1x1x1x20xf32>, vector<20x50xf32>, vector<1x1x1x50xf32> -> vector<1x1x1x50xf32>
    %157 = arith.addf %152, %156 : vector<1x1x1x50xf32>
    %c0_231 = arith.constant 0 : index
    %c1_232 = arith.constant 1 : index
    %c0_233 = arith.constant 0 : index
    %c0_234 = arith.constant 0 : index
    %158 = vector.load %arg12[%c0_231, %c1_232, %c0_233, %c0_234] : memref<1x4x4x20xf32, #tpu.memory_space<vmem>>, vector<1x1x1x20xf32>
    %c4_235 = arith.constant 4 : index
    %c0_236 = arith.constant 0 : index
    %c0_237 = arith.constant 0 : index
    %159 = vector.load %arg6[%c4_235, %c0_236, %c0_237] : memref<16x20x50xf32, #tpu.memory_space<vmem>>, vector<1x20x50xf32>
    %160 = vector.shape_cast %159 : vector<1x20x50xf32> to vector<20x50xf32>
    %cst_238 = arith.constant dense<0.000000e+00> : vector<1x1x1x50xf32>
    %161 = tpu.matmul %158, %160, %cst_238 {dimension_numbers = #tpu.dot_dimension_numbers<[3], [0], [0, 1, 2], [1], [0, 0, 0, 1, 0, 2, 1, 1], [], []>} : vector<1x1x1x20xf32>, vector<20x50xf32>, vector<1x1x1x50xf32> -> vector<1x1x1x50xf32>
    %162 = arith.addf %157, %161 : vector<1x1x1x50xf32>
    %c0_239 = arith.constant 0 : index
    %c1_240 = arith.constant 1 : index
    %c1_241 = arith.constant 1 : index
    %c0_242 = arith.constant 0 : index
    %163 = vector.load %arg12[%c0_239, %c1_240, %c1_241, %c0_242] : memref<1x4x4x20xf32, #tpu.memory_space<vmem>>, vector<1x1x1x20xf32>
    %c5_243 = arith.constant 5 : index
    %c0_244 = arith.constant 0 : index
    %c0_245 = arith.constant 0 : index
    %164 = vector.load %arg6[%c5_243, %c0_244, %c0_245] : memref<16x20x50xf32, #tpu.memory_space<vmem>>, vector<1x20x50xf32>
    %165 = vector.shape_cast %164 : vector<1x20x50xf32> to vector<20x50xf32>
    %cst_246 = arith.constant dense<0.000000e+00> : vector<1x1x1x50xf32>
    %166 = tpu.matmul %163, %165, %cst_246 {dimension_numbers = #tpu.dot_dimension_numbers<[3], [0], [0, 1, 2], [1], [0, 0, 0, 1, 0, 2, 1, 1], [], []>} : vector<1x1x1x20xf32>, vector<20x50xf32>, vector<1x1x1x50xf32> -> vector<1x1x1x50xf32>
    %167 = arith.addf %162, %166 : vector<1x1x1x50xf32>
    %c0_247 = arith.constant 0 : index
    %c1_248 = arith.constant 1 : index
    %c2_249 = arith.constant 2 : index
    %c0_250 = arith.constant 0 : index
    %168 = vector.load %arg12[%c0_247, %c1_248, %c2_249, %c0_250] : memref<1x4x4x20xf32, #tpu.memory_space<vmem>>, vector<1x1x1x20xf32>
    %c6_251 = arith.constant 6 : index
    %c0_252 = arith.constant 0 : index
    %c0_253 = arith.constant 0 : index
    %169 = vector.load %arg6[%c6_251, %c0_252, %c0_253] : memref<16x20x50xf32, #tpu.memory_space<vmem>>, vector<1x20x50xf32>
    %170 = vector.shape_cast %169 : vector<1x20x50xf32> to vector<20x50xf32>
    %cst_254 = arith.constant dense<0.000000e+00> : vector<1x1x1x50xf32>
    %171 = tpu.matmul %168, %170, %cst_254 {dimension_numbers = #tpu.dot_dimension_numbers<[3], [0], [0, 1, 2], [1], [0, 0, 0, 1, 0, 2, 1, 1], [], []>} : vector<1x1x1x20xf32>, vector<20x50xf32>, vector<1x1x1x50xf32> -> vector<1x1x1x50xf32>
    %172 = arith.addf %167, %171 : vector<1x1x1x50xf32>
    %c0_255 = arith.constant 0 : index
    %c1_256 = arith.constant 1 : index
    %c3_257 = arith.constant 3 : index
    %c0_258 = arith.constant 0 : index
    %173 = vector.load %arg12[%c0_255, %c1_256, %c3_257, %c0_258] : memref<1x4x4x20xf32, #tpu.memory_space<vmem>>, vector<1x1x1x20xf32>
    %c7_259 = arith.constant 7 : index
    %c0_260 = arith.constant 0 : index
    %c0_261 = arith.constant 0 : index
    %174 = vector.load %arg6[%c7_259, %c0_260, %c0_261] : memref<16x20x50xf32, #tpu.memory_space<vmem>>, vector<1x20x50xf32>
    %175 = vector.shape_cast %174 : vector<1x20x50xf32> to vector<20x50xf32>
    %cst_262 = arith.constant dense<0.000000e+00> : vector<1x1x1x50xf32>
    %176 = tpu.matmul %173, %175, %cst_262 {dimension_numbers = #tpu.dot_dimension_numbers<[3], [0], [0, 1, 2], [1], [0, 0, 0, 1, 0, 2, 1, 1], [], []>} : vector<1x1x1x20xf32>, vector<20x50xf32>, vector<1x1x1x50xf32> -> vector<1x1x1x50xf32>
    %177 = arith.addf %172, %176 : vector<1x1x1x50xf32>
    %c0_263 = arith.constant 0 : index
    %c2_264 = arith.constant 2 : index
    %c0_265 = arith.constant 0 : index
    %c0_266 = arith.constant 0 : index
    %178 = vector.load %arg12[%c0_263, %c2_264, %c0_265, %c0_266] : memref<1x4x4x20xf32, #tpu.memory_space<vmem>>, vector<1x1x1x20xf32>
    %c8_267 = arith.constant 8 : index
    %c0_268 = arith.constant 0 : index
    %c0_269 = arith.constant 0 : index
    %179 = vector.load %arg6[%c8_267, %c0_268, %c0_269] : memref<16x20x50xf32, #tpu.memory_space<vmem>>, vector<1x20x50xf32>
    %180 = vector.shape_cast %179 : vector<1x20x50xf32> to vector<20x50xf32>
    %cst_270 = arith.constant dense<0.000000e+00> : vector<1x1x1x50xf32>
    %181 = tpu.matmul %178, %180, %cst_270 {dimension_numbers = #tpu.dot_dimension_numbers<[3], [0], [0, 1, 2], [1], [0, 0, 0, 1, 0, 2, 1, 1], [], []>} : vector<1x1x1x20xf32>, vector<20x50xf32>, vector<1x1x1x50xf32> -> vector<1x1x1x50xf32>
    %182 = arith.addf %177, %181 : vector<1x1x1x50xf32>
    %c0_271 = arith.constant 0 : index
    %c2_272 = arith.constant 2 : index
    %c1_273 = arith.constant 1 : index
    %c0_274 = arith.constant 0 : index
    %183 = vector.load %arg12[%c0_271, %c2_272, %c1_273, %c0_274] : memref<1x4x4x20xf32, #tpu.memory_space<vmem>>, vector<1x1x1x20xf32>
    %c9_275 = arith.constant 9 : index
    %c0_276 = arith.constant 0 : index
    %c0_277 = arith.constant 0 : index
    %184 = vector.load %arg6[%c9_275, %c0_276, %c0_277] : memref<16x20x50xf32, #tpu.memory_space<vmem>>, vector<1x20x50xf32>
    %185 = vector.shape_cast %184 : vector<1x20x50xf32> to vector<20x50xf32>
    %cst_278 = arith.constant dense<0.000000e+00> : vector<1x1x1x50xf32>
    %186 = tpu.matmul %183, %185, %cst_278 {dimension_numbers = #tpu.dot_dimension_numbers<[3], [0], [0, 1, 2], [1], [0, 0, 0, 1, 0, 2, 1, 1], [], []>} : vector<1x1x1x20xf32>, vector<20x50xf32>, vector<1x1x1x50xf32> -> vector<1x1x1x50xf32>
    %187 = arith.addf %182, %186 : vector<1x1x1x50xf32>
    %c0_279 = arith.constant 0 : index
    %c2_280 = arith.constant 2 : index
    %c2_281 = arith.constant 2 : index
    %c0_282 = arith.constant 0 : index
    %188 = vector.load %arg12[%c0_279, %c2_280, %c2_281, %c0_282] : memref<1x4x4x20xf32, #tpu.memory_space<vmem>>, vector<1x1x1x20xf32>
    %c10_283 = arith.constant 10 : index
    %c0_284 = arith.constant 0 : index
    %c0_285 = arith.constant 0 : index
    %189 = vector.load %arg6[%c10_283, %c0_284, %c0_285] : memref<16x20x50xf32, #tpu.memory_space<vmem>>, vector<1x20x50xf32>
    %190 = vector.shape_cast %189 : vector<1x20x50xf32> to vector<20x50xf32>
    %cst_286 = arith.constant dense<0.000000e+00> : vector<1x1x1x50xf32>
    %191 = tpu.matmul %188, %190, %cst_286 {dimension_numbers = #tpu.dot_dimension_numbers<[3], [0], [0, 1, 2], [1], [0, 0, 0, 1, 0, 2, 1, 1], [], []>} : vector<1x1x1x20xf32>, vector<20x50xf32>, vector<1x1x1x50xf32> -> vector<1x1x1x50xf32>
    %192 = arith.addf %187, %191 : vector<1x1x1x50xf32>
    %c0_287 = arith.constant 0 : index
    %c2_288 = arith.constant 2 : index
    %c3_289 = arith.constant 3 : index
    %c0_290 = arith.constant 0 : index
    %193 = vector.load %arg12[%c0_287, %c2_288, %c3_289, %c0_290] : memref<1x4x4x20xf32, #tpu.memory_space<vmem>>, vector<1x1x1x20xf32>
    %c11_291 = arith.constant 11 : index
    %c0_292 = arith.constant 0 : index
    %c0_293 = arith.constant 0 : index
    %194 = vector.load %arg6[%c11_291, %c0_292, %c0_293] : memref<16x20x50xf32, #tpu.memory_space<vmem>>, vector<1x20x50xf32>
    %195 = vector.shape_cast %194 : vector<1x20x50xf32> to vector<20x50xf32>
    %cst_294 = arith.constant dense<0.000000e+00> : vector<1x1x1x50xf32>
    %196 = tpu.matmul %193, %195, %cst_294 {dimension_numbers = #tpu.dot_dimension_numbers<[3], [0], [0, 1, 2], [1], [0, 0, 0, 1, 0, 2, 1, 1], [], []>} : vector<1x1x1x20xf32>, vector<20x50xf32>, vector<1x1x1x50xf32> -> vector<1x1x1x50xf32>
    %197 = arith.addf %192, %196 : vector<1x1x1x50xf32>
    %c0_295 = arith.constant 0 : index
    %c3_296 = arith.constant 3 : index
    %c0_297 = arith.constant 0 : index
    %c0_298 = arith.constant 0 : index
    %198 = vector.load %arg12[%c0_295, %c3_296, %c0_297, %c0_298] : memref<1x4x4x20xf32, #tpu.memory_space<vmem>>, vector<1x1x1x20xf32>
    %c12_299 = arith.constant 12 : index
    %c0_300 = arith.constant 0 : index
    %c0_301 = arith.constant 0 : index
    %199 = vector.load %arg6[%c12_299, %c0_300, %c0_301] : memref<16x20x50xf32, #tpu.memory_space<vmem>>, vector<1x20x50xf32>
    %200 = vector.shape_cast %199 : vector<1x20x50xf32> to vector<20x50xf32>
    %cst_302 = arith.constant dense<0.000000e+00> : vector<1x1x1x50xf32>
    %201 = tpu.matmul %198, %200, %cst_302 {dimension_numbers = #tpu.dot_dimension_numbers<[3], [0], [0, 1, 2], [1], [0, 0, 0, 1, 0, 2, 1, 1], [], []>} : vector<1x1x1x20xf32>, vector<20x50xf32>, vector<1x1x1x50xf32> -> vector<1x1x1x50xf32>
    %202 = arith.addf %197, %201 : vector<1x1x1x50xf32>
    %c0_303 = arith.constant 0 : index
    %c3_304 = arith.constant 3 : index
    %c1_305 = arith.constant 1 : index
    %c0_306 = arith.constant 0 : index
    %203 = vector.load %arg12[%c0_303, %c3_304, %c1_305, %c0_306] : memref<1x4x4x20xf32, #tpu.memory_space<vmem>>, vector<1x1x1x20xf32>
    %c13_307 = arith.constant 13 : index
    %c0_308 = arith.constant 0 : index
    %c0_309 = arith.constant 0 : index
    %204 = vector.load %arg6[%c13_307, %c0_308, %c0_309] : memref<16x20x50xf32, #tpu.memory_space<vmem>>, vector<1x20x50xf32>
    %205 = vector.shape_cast %204 : vector<1x20x50xf32> to vector<20x50xf32>
    %cst_310 = arith.constant dense<0.000000e+00> : vector<1x1x1x50xf32>
    %206 = tpu.matmul %203, %205, %cst_310 {dimension_numbers = #tpu.dot_dimension_numbers<[3], [0], [0, 1, 2], [1], [0, 0, 0, 1, 0, 2, 1, 1], [], []>} : vector<1x1x1x20xf32>, vector<20x50xf32>, vector<1x1x1x50xf32> -> vector<1x1x1x50xf32>
    %207 = arith.addf %202, %206 : vector<1x1x1x50xf32>
    %c0_311 = arith.constant 0 : index
    %c3_312 = arith.constant 3 : index
    %c2_313 = arith.constant 2 : index
    %c0_314 = arith.constant 0 : index
    %208 = vector.load %arg12[%c0_311, %c3_312, %c2_313, %c0_314] : memref<1x4x4x20xf32, #tpu.memory_space<vmem>>, vector<1x1x1x20xf32>
    %c14_315 = arith.constant 14 : index
    %c0_316 = arith.constant 0 : index
    %c0_317 = arith.constant 0 : index
    %209 = vector.load %arg6[%c14_315, %c0_316, %c0_317] : memref<16x20x50xf32, #tpu.memory_space<vmem>>, vector<1x20x50xf32>
    %210 = vector.shape_cast %209 : vector<1x20x50xf32> to vector<20x50xf32>
    %cst_318 = arith.constant dense<0.000000e+00> : vector<1x1x1x50xf32>
    %211 = tpu.matmul %208, %210, %cst_318 {dimension_numbers = #tpu.dot_dimension_numbers<[3], [0], [0, 1, 2], [1], [0, 0, 0, 1, 0, 2, 1, 1], [], []>} : vector<1x1x1x20xf32>, vector<20x50xf32>, vector<1x1x1x50xf32> -> vector<1x1x1x50xf32>
    %212 = arith.addf %207, %211 : vector<1x1x1x50xf32>
    %c0_319 = arith.constant 0 : index
    %c3_320 = arith.constant 3 : index
    %c3_321 = arith.constant 3 : index
    %c0_322 = arith.constant 0 : index
    %213 = vector.load %arg12[%c0_319, %c3_320, %c3_321, %c0_322] : memref<1x4x4x20xf32, #tpu.memory_space<vmem>>, vector<1x1x1x20xf32>
    %c15_323 = arith.constant 15 : index
    %c0_324 = arith.constant 0 : index
    %c0_325 = arith.constant 0 : index
    %214 = vector.load %arg6[%c15_323, %c0_324, %c0_325] : memref<16x20x50xf32, #tpu.memory_space<vmem>>, vector<1x20x50xf32>
    %215 = vector.shape_cast %214 : vector<1x20x50xf32> to vector<20x50xf32>
    %cst_326 = arith.constant dense<0.000000e+00> : vector<1x1x1x50xf32>
    %216 = tpu.matmul %213, %215, %cst_326 {dimension_numbers = #tpu.dot_dimension_numbers<[3], [0], [0, 1, 2], [1], [0, 0, 0, 1, 0, 2, 1, 1], [], []>} : vector<1x1x1x20xf32>, vector<20x50xf32>, vector<1x1x1x50xf32> -> vector<1x1x1x50xf32>
    %217 = arith.addf %212, %216 : vector<1x1x1x50xf32>
    %c0_327 = arith.constant 0 : index
    %c0_328 = arith.constant 0 : index
    %c0_329 = arith.constant 0 : index
    %c0_330 = arith.constant 0 : index
    %218 = vector.load %arg7[%c0_327, %c0_328, %c0_329, %c0_330] : memref<1x1x1x50xf32, #tpu.memory_space<vmem>>, vector<1x1x1x50xf32>
    %219 = arith.addf %217, %218 : vector<1x1x1x50xf32>
    %cst_331 = arith.constant 0.000000e+00 : f32
    %220 = vector.broadcast %cst_331 : f32 to vector<1x1x1x50xf32>
    %221 = arith.maximumf %219, %220 : vector<1x1x1x50xf32>
    %c0_332 = arith.constant 0 : index
    %c0_333 = arith.constant 0 : index
    %222 = vector.load %arg8[%c0_332, %c0_333] : memref<50x10xf32, #tpu.memory_space<vmem>>, vector<50x10xf32>
    %cst_334 = arith.constant dense<0.000000e+00> : vector<1x1x1x10xf32>
    %223 = tpu.matmul %221, %222, %cst_334 {dimension_numbers = #tpu.dot_dimension_numbers<[3], [0], [0, 1, 2], [1], [0, 0, 0, 1, 0, 2, 1, 1], [], []>} : vector<1x1x1x50xf32>, vector<50x10xf32>, vector<1x1x1x10xf32> -> vector<1x1x1x10xf32>
    %c0_335 = arith.constant 0 : index
    %c0_336 = arith.constant 0 : index
    %c0_337 = arith.constant 0 : index
    %c0_338 = arith.constant 0 : index
    %224 = vector.load %arg9[%c0_335, %c0_336, %c0_337, %c0_338] : memref<1x1x1x10xf32, #tpu.memory_space<vmem>>, vector<1x1x1x10xf32>
    %225 = arith.addf %223, %224 : vector<1x1x1x10xf32>
    %c0_339 = arith.constant 0 : index
    %c0_340 = arith.constant 0 : index
    %c0_341 = arith.constant 0 : index
    %c0_342 = arith.constant 0 : index
    %226 = vector.load %arg10[%c0_339, %c0_340, %c0_341, %c0_342] : memref<1x1x1x10xf32, #tpu.memory_space<vmem>>, vector<1x1x1x10xf32>
    tpu.vector_store %arg10[%c0_339, %c0_340, %c0_341, %c0_342], %225 {strides = array<i32>} : memref<1x1x1x10xf32, #tpu.memory_space<vmem>>, vector<1x1x1x10xf32>,
    return
  }
  func.func @transform_0(%arg0: i32) -> (i32, i32, i32, i32) {
    %c0_i32 = arith.constant 0 : i32
    %c0_i32_0 = arith.constant 0 : i32
    %c0_i32_1 = arith.constant 0 : i32
    %c0_i32_2 = arith.constant 0 : i32
    return %arg0, %c0_i32, %c0_i32_0, %c0_i32_1 : i32, i32, i32, i32
  }
  func.func @transform_1(%arg0: i32) -> (i32, i32) {
    %c0_i32 = arith.constant 0 : i32
    %c0_i32_0 = arith.constant 0 : i32
    %c0_i32_1 = arith.constant 0 : i32
    return %c0_i32, %c0_i32_0 : i32, i32
  }
  func.func @transform_2(%arg0: i32) -> (i32, i32, i32, i32) {
    %c0_i32 = arith.constant 0 : i32
    %c0_i32_0 = arith.constant 0 : i32
    %c0_i32_1 = arith.constant 0 : i32
    %c0_i32_2 = arith.constant 0 : i32
    %c0_i32_3 = arith.constant 0 : i32
    return %c0_i32, %c0_i32_0, %c0_i32_1, %c0_i32_2 : i32, i32, i32, i32
  }
  func.func @transform_3(%arg0: i32) -> (i32, i32, i32) {
    %c0_i32 = arith.constant 0 : i32
    %c0_i32_0 = arith.constant 0 : i32
    %c0_i32_1 = arith.constant 0 : i32
    %c0_i32_2 = arith.constant 0 : i32
    return %c0_i32, %c0_i32_0, %c0_i32_1 : i32, i32, i32
  }
  func.func @transform_4(%arg0: i32) -> (i32, i32, i32, i32) {
    %c0_i32 = arith.constant 0 : i32
    %c0_i32_0 = arith.constant 0 : i32
    %c0_i32_1 = arith.constant 0 : i32
    %c0_i32_2 = arith.constant 0 : i32
    %c0_i32_3 = arith.constant 0 : i32
    return %c0_i32, %c0_i32_0, %c0_i32_1, %c0_i32_2 : i32, i32, i32, i32
  }
  func.func @transform_5(%arg0: i32) -> (i32, i32, i32) {
    %c0_i32 = arith.constant 0 : i32
    %c0_i32_0 = arith.constant 0 : i32
    %c0_i32_1 = arith.constant 0 : i32
    %c0_i32_2 = arith.constant 0 : i32
    return %c0_i32, %c0_i32_0, %c0_i32_1 : i32, i32, i32
  }
  func.func @transform_6(%arg0: i32) -> (i32, i32, i32, i32) {
    %c0_i32 = arith.constant 0 : i32
    %c0_i32_0 = arith.constant 0 : i32
    %c0_i32_1 = arith.constant 0 : i32
    %c0_i32_2 = arith.constant 0 : i32
    %c0_i32_3 = arith.constant 0 : i32
    return %c0_i32, %c0_i32_0, %c0_i32_1, %c0_i32_2 : i32, i32, i32, i32
  }
  func.func @transform_7(%arg0: i32) -> (i32, i32) {
    %c0_i32 = arith.constant 0 : i32
    %c0_i32_0 = arith.constant 0 : i32
    %c0_i32_1 = arith.constant 0 : i32
    return %c0_i32, %c0_i32_0 : i32, i32
  }
  func.func @transform_8(%arg0: i32) -> (i32, i32, i32, i32) {
    %c0_i32 = arith.constant 0 : i32
    %c0_i32_0 = arith.constant 0 : i32
    %c0_i32_1 = arith.constant 0 : i32
    %c0_i32_2 = arith.constant 0 : i32
    %c0_i32_3 = arith.constant 0 : i32
    return %c0_i32, %c0_i32_0, %c0_i32_1, %c0_i32_2 : i32, i32, i32, i32
  }
  func.func @transform_9(%arg0: i32) -> (i32, i32, i32, i32) {
    %c0_i32 = arith.constant 0 : i32
    %c0_i32_0 = arith.constant 0 : i32
    %c0_i32_1 = arith.constant 0 : i32
    %c0_i32_2 = arith.constant 0 : i32
    return %arg0, %c0_i32, %c0_i32_0, %c0_i32_1 : i32, i32, i32, i32
  }
}

</mosaic_0001>

<bundles_post_ra>
// kernel: simple_model_forward.1
= control target key start
LH: loop header
LB: loop body
LE: loop exit
PB: predicated region body
PF: predicated region fallthrough
CT: control target
= control target key end

     0   :  { %14 = vsyncpa [#allocation5], 0  ;;  %s6587_s0 = inlined_call_operand.vmem [shape: f32[2,8,8,32], index: 0, kind: input, shape index: {}]   ;;  %s6588_s1 = inlined_call_operand.vmem [shape: f32[32,10], index: 1, kind: input, shape index: {}]   ;;  %s6589_s2 = inlined_call_operand.vmem [shape: f32[1,1,1,10], index: 2, kind: input, shape index: {}]   ;;  %s6590_s3 = inlined_call_operand.vmem [shape: f32[25,10,20], index: 3, kind: input, shape index: {}]   ;;  %s6591_s4 = inlined_call_operand.vmem [shape: f32[1,1,1,20], index: 4, kind: input, shape index: {}]   ;;  %s6592_s5 = inlined_call_operand.vmem [shape: f32[16,20,50], index: 5, kind: input, shape index: {}]   ;;  %s6593_s6 = inlined_call_operand.vmem [shape: f32[1,1,1,50], index: 6, kind: input, shape index: {}]   ;;  %s6594_s7 = inlined_call_operand.vmem [shape: f32[50,10], index: 7, kind: input, shape index: {}]   ;;  %s6595_s8 = inlined_call_operand.vmem [shape: f32[1,1,1,10], index: 8, kind: input, shape index: {}]   ;;  %s6596_s9 = inlined_call_operand.hbm [shape: f32[2,1,1,10], index: 9, kind: output, shape index: {}]  }
   0x1   :  { %16 = vsyncpa [#allocation5 + $0x1], 0  ;;  %s5794_s30 = smov 0   ;;  %s5796_s10 = smov 0  }
   0x2   :  { %s5798_s11 = smov 0   ;;  %s5800_s12 = smov 0  }
   0x3 LB: > { %s5815_s13 = sadd.s32 4294967295, %s5737_s12   ;;  %s4603_s14 = sadd.s32 4294967294, %s5737_s12   ;;  %s5737_s12 = sphi %s5800_s12, %s6604_s12   ;;  %s5733_s11 = sphi %s5798_s11, %s6603_s11   ;;  %s5729_s10 = sphi %s5796_s10, %s6602_s10   ;;  %s5725_s30 = sphi %s5794_s30, %s6601_s30  }
   0x4   : > { %s5819_s15 = sadd.s32 1, %s5737_s12   ;;  %s223_s16 = sadd.s32 1, %s5733_s11 }
   0x5   : > { %s220_s17 = ssub.s32 %s5737_s12, %s5819_s15  ;;  %p233_p0 = scmp.ne.s32.totalorder %s5733_s11, %s5729_s10 }
   0x6   : > { %p221_p1 = scmp.eq.s32.totalorder %s220_s17, 0  ;;  %p234_p2 = scmp.eq.s32.totalorder %s5815_s13, 1 }
   0x7   : > { %p239_p3 = scmp.ne.s32.totalorder %s5729_s10, %s5725_s30  ;;  %p240_p4 = scmp.eq.s32.totalorder %s4603_s14, 1 }
   0x8   : > { %s5830_s18 = scalar_select %p221_p1, %s5733_s11, %s223_s16  }
   0x9   : > { %p5832_p5 = por %p234_p2, %p233_p0  ;;  %p5836_p6 = por %p240_p4, %p239_p3 }
   0xa   : > { %p4606_p7 = scmp.ge.s32.totalorder %s5737_s12, 1  ;;  %p290_p8 = scmp.lt.s32.totalorder %s5737_s12, 3 }
   0xc   : > { %p291_p9 = pnand %p4606_p7, %p290_p8 }
   0xd   : > { %v338_v0 = vld [vmem:[%s6588_s1] sm:$0xff] (!%p291_p9)  ;;  %v339_v1 = vld [vmem:[%s6588_s1 + $0x8] sm:$0xff] (!%p291_p9)  ;;  %v340_v2 = vld [vmem:[%s6588_s1 + $0x10] sm:$0xff] (!%p291_p9)  ;;  %p325_p10 = scmp.lt.s32.totalorder (!%p291_p9), %s5815_s13, 1  ;;  %vm349_vm0 = vcmask (!%p291_p9), 261120   ;;  %vm519_vm1 = vcmask (!%p291_p9), 1041408  }
   0xe   : > { %294 = sbr.rel (%p291_p9) target bundleno = 1042 (0x412), region = 56  ;;  %v5365_v3 = vpack.c.bf16 (!%p291_p9), %v339_v1, %v338_v0  ;;  %v341_v4 = vld [vmem:[%s6588_s1 + $0x18] sm:$0xff] (!%p291_p9)  ;;  %v4618_v14 = vld [vmem:[%s6590_s3 + $0x10] sm:$0xff] (!%p291_p9)  ;;  %vm5739_vm2 = vmmov (!%p291_p9), 1   ;;  %v500_v21 = vld [vmem:[%s6590_s3] sm:$0xff] (!%p291_p9)  ;;  %vm487_vm4 = vcmask (!%p291_p9), 80896  }
   0xf   : > { %v5369_v5 = vpack.c.bf16 (!%p291_p9), %v341_v4, %v340_v2  ;;  %v4619_v15 = vld [vmem:[%s6590_s3 + $0x18] sm:$0x3] (!%p291_p9)  ;;  %vm5874_vm3 = vmpackc.low (!%p291_p9), %vm519_vm1, %vm5739_vm2  ;;  %v4641_v18 = vld [vmem:[%s6590_s3 + $0x50] sm:$0xff] (!%p291_p9)  ;;  %vm5741_vm5 = vmmov (!%p291_p9), 0   ;;  %vm3144_vm6 = vcmask (!%p291_p9), 1043456   ;;  %vm3126_vm7 = vcmask (!%p291_p9), 158720  }
  0x10   : > { %5366 = vmatprep.subr.bf16.mxu0 (!%p291_p9), %v5365_v3  ;;  %v5373_v16 = vpack.c.bf16 (!%p291_p9), %v4619_v15, %v4618_v14  ;;  %v4642_v19 = vld [vmem:[%s6590_s3 + $0x58] sm:$0x3] (!%p291_p9)  ;;  %v501_v22 = vld [vmem:[%s6590_s3 + $0x8] sm:$0x3] (!%p291_p9)  ;;  %v4651_v24 = vld [vmem:[%s6590_s3 + $0x70] sm:$0xff] (!%p291_p9)  ;;  %vm3140_vm8 = vcmask (!%p291_p9), 162816  }
  0x11   : > { %5368 = vmatpush3.bf16.msra.mxu0 (!%p291_p9), %v5365_v3  ;;  %v5403_v20 = vpack.c.bf16 (!%p291_p9), %v4642_v19, %v4641_v18  ;;  %v5379_v23 = vpack.c.bf16 (!%p291_p9), %v501_v22, %v500_v21  ;;  %v4652_v25 = vld [vmem:[%s6590_s3 + $0x78] sm:$0x3] (!%p291_p9)  ;;  %v4609_v27 = vld [vmem:[%s6589_s2] ss:$0 sm:$0xff] (!%p291_p9)  ;;  %v4627_v50 = vld [vmem:[%s6590_s3 + $0x28] sm:$0x3] (!%p291_p9) }
  0x12   : > { %5370 = vmatprep.subr.bf16.mxu0 (!%p291_p9), %v5369_v5  ;;  %5375 = vmatprep.subr.msk.bf16.mxu1 (!%p291_p9), %vm5874_vm3, %v5373_v16  ;;  %v5415_v26 = vpack.c.bf16 (!%p291_p9), %v4652_v25, %v4651_v24  ;;  %v4626_v47 = vld [vmem:[%s6590_s3 + $0x20] sm:$0xff] (!%p291_p9)  ;;  %v4661_v54 = vld [vmem:[%s6590_s3 + $0x90] sm:$0xff] (!%p291_p9)  ;;  %v4662_v58 = vld [vmem:[%s6590_s3 + $0x98] sm:$0x3] (!%p291_p9)  ;;  %vm4456_vm9 = vcmask (!%p291_p9), 408576   ;;  %s323_s22 = sand.u32 (!%p291_p9), 1, %s5729_s10  }
  0x13   : > { %5378 = vmatpush3.bf16.msk.msra.mxu1 (!%p291_p9), %vm5874_vm3, %v5373_v16  ;;  %v5385_v56 = vpack.c.bf16 (!%p291_p9), %v4627_v50, %v4626_v47  ;;  %v5427_v62 = vpack.c.bf16 (!%p291_p9), %v4662_v58, %v4661_v54  ;;  %v4631_v63 = vld [vmem:[%s6590_s3 + $0x30] sm:$0xff] (!%p291_p9)  ;;  %v4632_v0 = vld [vmem:[%s6590_s3 + $0x38] sm:$0x3] (!%p291_p9)  ;;  %v4646_v16 = vld [vmem:[%s6590_s3 + $0x60] sm:$0xff] (!%p291_p9)  ;;  %s4821_s25 = sshll.u32 (!%p291_p9), %s5815_s13, 4  ;;  %s324_s26 = scalar_lea.vmem (!%p291_p9), [#allocation4], %s323_s22 }
  0x14   : > { %5381 = vmatprep.subr.msk.bf16.mxu1 (!%p291_p9), %vm5874_vm3, %v5379_v23  ;;  %v4671_v2 = vld [vmem:[%s6590_s3 + $0xb0] sm:$0xff] (!%p291_p9)  ;;  %v4672_v3 = vld [vmem:[%s6590_s3 + $0xb8] sm:$0x3] (!%p291_p9)  ;;  %v4647_v18 = vld [vmem:[%s6590_s3 + $0x68] sm:$0x3] (!%p291_p9)  ;;  %s4548_s27 = sshll.u32 (!%p291_p9), %s324_s26, 4  ;;  %s6547_s27 = int_to_ptr.vmem [resolvable:$true] %s4548_s27 }
  0x15   : > { %s326_s29 = scalar_select %p325_p10, %s5815_s13, 1  ;;  %5372 = vmatpush3.bf16.msra.mxu0 %v5369_v5  ;;  %v4691_v21 = vld [vmem:[%s6590_s3 + $0xf0] sm:$0xff]  ;;  %v4692_v22 = vld [vmem:[%s6590_s3 + $0xf8] sm:$0x3]  ;;  %v4676_v47 = vld [vmem:[%s6590_s3 + $0xc0] sm:$0xff]  ;;  %vm4533_vm10 = vcmask 73728  }
  0x16   : > { %5405 = vmatprep.subr.msk.bf16.mxu0 %vm5874_vm3, %v5403_v20  ;;  %v4687_v58 = vld [vmem:[%s6590_s3 + $0xe8] sm:$0x3]  ;;  %s4536_s16 = scalar_lea.sflag [#allocation5], %s323_s22  ;;  %s5675_s17 = scalar_lea.vmem %s6547_s27, 16 }
  0x17   : > { %s4824_s14 = sshll.u32 %s326_s29, 6  ;;  %p5676_p11 = scmp.ne.s32.totalorder %s6547_s27, %s5675_s17 }
  0x18   : > { %s329_s21 = scalar_lea.vmem %s6587_s0, %s4824_s14  ;;  %s6545_s14 = scalar_lea.hbm %s6596_s9, %s4821_s25 }
  0x19   : > { %v330_v6 = vld [vmem:[%s329_s21] sm:$0xff]  ;;  %v331_v7 = vld [vmem:[%s329_s21 + $0x8] sm:$0xff]  ;;  %v332_v8 = vld [vmem:[%s329_s21 + $0x10] sm:$0xff]  ;;  %p5677_p12 = pnand %p5676_p11, %p5832_p5  ;;  %s5743_s13 = smov [#allocation4]  }
  0x1a   : > { %5017 = vmatprep.mubr.msk.f32.mxu0 %vm349_vm0, %v330_v6  ;;  %v333_v9 = vld [vmem:[%s329_s21 + $0x18] sm:$0xff]  ;;  %v334_v10 = vld [vmem:[%s329_s21 + $0x20] sm:$0xff]  ;;  %v335_v11 = vld [vmem:[%s329_s21 + $0x28] sm:$0xff] }
  0x1b   : > { %5018 = vmatmul.mubr.msk.f32.vlgmr.msra.gmra.mrb[0].mxu0 %vm349_vm0, %v331_v7  ;;  %v336_v12 = vld [vmem:[%s329_s21 + $0x30] sm:$0xff]  ;;  %v337_v13 = vld [vmem:[%s329_s21 + $0x38] sm:$0xff]  ;;  %v4636_v6 = vld [vmem:[%s6590_s3 + $0x40] sm:$0xff]  ;;  %p5678_p13 = pneg %p5677_p12  ;;  %s5679_s21 = sshll.u32 %s5743_s13, 4  ;;  %s5680_s21 = int_to_ptr.vmem [resolvable:$false] %s5679_s21 }
  0x1c   : > { %5020 = vmatprep.mubr.msk.f32.mxu0 %vm349_vm0, %v332_v8  ;;  %5408 = vmatpush3.bf16.msk.msra.mxu0 %vm5874_vm3, %v5403_v20  ;;  %v4637_v7 = vld [vmem:[%s6590_s3 + $0x48] sm:$0x3]  ;;  %s5681_s23 = scalar_lea.vmem %s5680_s21, 32  ;;  %p5682_p0 = scmp.lt.s32.totalorder %s6547_s27, %s5680_s21 }
  0x1d   : > { %5417 = vmatprep.subr.msk.bf16.mxu0 %vm5874_vm3, %v5415_v26  ;;  %v5397_v20 = vpack.c.bf16 %v4637_v7, %v4636_v6  ;;  %p5683_p1 = scmp.lt.s32.totalorder %s5681_s23, %s5675_s17 }
  0x1f   : > { %5021 = vmatmul.mubr.msk.f32.gmra.mrb[2].mxu0 %vm349_vm0, %v333_v9  ;;  %v5391_v9 = vpack.c.bf16 %v4632_v0, %v4631_v63  ;;  %p5684_p2 = por %p5683_p1, %p5682_p0 }
  0x20   : > { %5023 = vmatprep.mubr.msk.f32.mxu0 %vm349_vm0, %v334_v10  ;;  %v5439_v10 = vpack.c.bf16 %v4672_v3, %v4671_v2  ;;  %v4696_v3 = vld [vmem:[%s6590_s3 + $0x100] sm:$0xff] }
  0x21   : > { %p5685_p3 = pnand %p5684_p2, %p5678_p13 }
  0x23   : > { %5024 = vmatmul.mubr.msk.f32.gmra.mrb[4].mxu0 %vm349_vm0, %v335_v11  ;;  %v4681_v11 = vld [vmem:[%s6590_s3 + $0xd0] sm:$0xff] }
  0x24   : > { %5026 = vmatprep.mubr.msk.f32.mxu0 %vm349_vm0, %v336_v12  ;;  %v4682_v12 = vld [vmem:[%s6590_s3 + $0xd8] sm:$0x3] }
  0x25   : > { %v5451_v24 = vpack.c.bf16 %v4682_v12, %v4681_v11  ;;  %v4707_v11 = vld [vmem:[%s6590_s3 + $0x128] sm:$0x3] }
  0x27   : > { %5027 = vmatmul.mubr.msk.f32.gmra.mrb[6].mxu0 %vm349_vm0, %v337_v13 }
  0xee   : > { %v5019_v28 = vpop.f32.mrb[0].mxu0 }
  0xef   : > { %v446_v29 = vadd.f32 %v5019_v28, %v4609_v27  ;;  %v440_v30 = vpop.f32.mrb[1].mxu0  ;;  %v4657_v28 = vld [vmem:[%s6590_s3 + $0x88] sm:$0x3] }
  0xf0   : > { %v441_v31 = vadd.f32 %v4609_v27, %v440_v30  ;;  %v5409_v30 = vpack.c.bf16 %v4647_v18, %v4646_v16  ;;  %v4716_v18 = vld [vmem:[%s6590_s3 + $0x140] sm:$0xff] }
  0xf1   : > { %v480_v32 = vmax.f32 %v446_v29, 0.0 }
  0xf2   : > { %v479_v33 = vmax.f32 %v441_v31, 0.0  ;;  %v5022_v34 = vpop.f32.mrb[2].mxu0  ;;  %v4701_v31 = vld [vmem:[%s6590_s3 + $0x110] sm:$0xff] }
  0xf3   : > { %489 = vst.msk [vmem:[#allocation2 + $0x8] sm:$0xff] %vm487_vm4, %v480_v32  ;;  %v456_v35 = vadd.f32 %v5022_v34, %v4609_v27  ;;  %v450_v36 = vpop.f32.mrb[3].mxu0  ;;  %v4702_v32 = vld [vmem:[%s6590_s3 + $0x118] sm:$0x3]  ;;  %v5463_v34 = vpack.c.bf16 %v4692_v22, %v4691_v21  ;;  %v4717_v21 = vld [vmem:[%s6590_s3 + $0x148] sm:$0x3] }
  0xf4   : > { %488 = vst.msk [vmem:[#allocation2] sm:$0xff] %vm487_vm4, %v479_v33  ;;  %v451_v37 = vadd.f32 %v4609_v27, %v450_v36 }
  0xf5   : > { %v482_v38 = vmax.f32 %v456_v35, 0.0 }
  0xf6   : > { %v481_v39 = vmax.f32 %v451_v37, 0.0  ;;  %v5025_v40 = vpop.f32.mrb[4].mxu0  ;;  %v4666_v37 = vld [vmem:[%s6590_s3 + $0xa0] sm:$0xff] }
  0xf7   : > { %491 = vst.msk [vmem:[#allocation2 + $0x18] sm:$0xff] %vm487_vm4, %v482_v38  ;;  %v466_v41 = vadd.f32 %v5025_v40, %v4609_v27  ;;  %v460_v42 = vpop.f32.mrb[5].mxu0  ;;  %v4667_v38 = vld [vmem:[%s6590_s3 + $0xa8] sm:$0x3] }
  0xf8   : > { %490 = vst.msk [vmem:[#allocation2 + $0x10] sm:$0xff] %vm487_vm4, %v481_v39  ;;  %v461_v43 = vadd.f32 %v4609_v27, %v460_v42  ;;  %v4712_v42 = vld [vmem:[%s6590_s3 + $0x138] sm:$0x3]  ;;  %v5433_v50 = vpack.c.bf16 %v4667_v38, %v4666_v37 }
  0xf9   : > { %v484_v44 = vmax.f32 %v466_v41, 0.0  ;;  %v4711_v41 = vld [vmem:[%s6590_s3 + $0x130] sm:$0xff] }
  0xfa   : > { %v483_v45 = vmax.f32 %v461_v43, 0.0  ;;  %v5028_v46 = vpop.f32.mrb[6].mxu0  ;;  %v5487_v54 = vpack.c.bf16 %v4712_v42, %v4711_v41  ;;  %v4749_v41 = vld [vmem:[%s6592_s5 + $0x30] sm:$0xff]  ;;  %v5740_v42 = vmov 0.0|0.0  }
  0xfb   : > { %493 = vst.msk [vmem:[#allocation2 + $0x28] sm:$0xff] %vm487_vm4, %v484_v44  ;;  %v5625_v48 = vld [vmem:[#allocation2 + $0x1] ss:$8 sps:$4 sm:$0xff]   ;;  %v476_v49 = vadd.f32 %v5028_v46, %v4609_v27  ;;  %v470_v52 = vpop.f32.mrb[7].mxu0  ;;  %v5475_v44 = vpack.c.bf16 %v4702_v32, %v4701_v31 }
  0xfc   : > { %492 = vst.msk [vmem:[#allocation2 + $0x20] sm:$0xff] %vm487_vm4, %v483_v45  ;;  %5033 = vmatprep.mubr.msk.f32.mxu1 %vm487_vm4, %v5625_v48  ;;  %v471_v53 = vadd.f32 %v4609_v27, %v470_v52  ;;  %v5628_v59 = vld [vmem:[#allocation2] ss:$8 sps:$4 sm:$0xff]   ;;  %v5641_v29 = vld [vmem:[#allocation2 + $0x4] ss:$8 sps:$4 sm:$0xff]  }
  0xfd   : > { %v486_v51 = vmax.f32 %v476_v49, 0.0  ;;  %v5633_v8 = vld [vmem:[#allocation2 + $0x2] ss:$8 sps:$4 sm:$0xff]   ;;  %v4677_v48 = vld [vmem:[%s6590_s3 + $0xc8] sm:$0x3] }
  0xfe   : > { %v485_v60 = vmax.f32 %v471_v53, 0.0  ;;  %v5637_v19 = vld [vmem:[#allocation2 + $0x3] ss:$8 sps:$4 sm:$0xff]   ;;  %v4722_v52 = vld [vmem:[%s6590_s3 + $0x158] sm:$0x3] }
  0xff   : > { %v5626_v55 = vld [vmem:[#allocation2 + $0x11] ss:$8 sps:$4 sm:$0xff]   ;;  %495 = vst.msk [vmem:[#allocation2 + $0x38] sm:$0xff] %vm487_vm4, %v486_v51  ;;  %v4656_v27 = vld [vmem:[%s6590_s3 + $0x80] sm:$0xff]  ;;  %v4737_v32 = vld [vmem:[%s6590_s3 + $0x188] sm:$0x3] }
 0x100   : > { %v5627_v57 = vld [vmem:[#allocation2 + $0x8] ss:$8 sps:$4 sm:$0xff]   ;;  %5034 = vmatmul.mubr.msk.f32.vlgmr.msra.gmra.mrb[0].mxu1 %vm487_vm4, %v5626_v55  ;;  %494 = vst.msk [vmem:[#allocation2 + $0x30] sm:$0xff] %vm487_vm4, %v485_v60  ;;  %v5634_v13 = vld [vmem:[#allocation2 + $0xc] ss:$8 sps:$4 sm:$0xff]   ;;  %v5421_v40 = vpack.c.bf16 %v4657_v28, %v4656_v27  ;;  %v5445_v60 = vpack.c.bf16 %v4677_v48, %v4676_v47  ;;  %v4736_v31 = vld [vmem:[%s6590_s3 + $0x180] sm:$0xff] }
 0x101   : > { %5068 = vmatprep.mubr.msk.f32.mxu0 %vm487_vm4, %v5627_v57  ;;  %5384 = vmatpush3.bf16.msk.msra.mxu1 %vm5874_vm3, %v5379_v23  ;;  %v5630_v1 = vld [vmem:[#allocation2 + $0xa] ss:$8 sps:$4 sm:$0xff]   ;;  %v4686_v57 = vld [vmem:[%s6590_s3 + $0xe0] sm:$0xff] }
 0x102   : > { %5040 = vmatprep.mubr.msk.f32.mxu1 %vm487_vm4, %v5628_v59  ;;  %5387 = vmatprep.subr.msk.bf16.mxu1 %vm5874_vm3, %v5385_v56  ;;  %v5631_v4 = vld [vmem:[#allocation2 + $0x10] ss:$8 sps:$4 sm:$0xff]   ;;  %v5643_v36 = vld [vmem:[#allocation2 + $0x14] ss:$8 sps:$4 sm:$0xff]   ;;  %v5457_v6 = vpack.c.bf16 %v4687_v58, %v4686_v57  ;;  %v4751_v47 = vld [vmem:[%s6592_s5 + $0x40] sm:$0xf] }
 0x103   : > { %v5629_v61 = vld [vmem:[#allocation2 + $0x18] ss:$8 sps:$4 sm:$0xff]   ;;  %v5636_v15 = vld [vmem:[#allocation2 + $0x1c] ss:$8 sps:$4 sm:$0xff]   ;;  %v5645_v39 = vld [vmem:[#allocation2 + $0x9] ss:$8 sps:$4 sm:$0xff]  }
 0x104   : > { %5069 = vmatmul.mubr.msk.f32.vlgmr.msra.gmra.mrb[8].mxu0 %vm487_vm4, %v5629_v61  ;;  %v5632_v5 = vld [vmem:[#allocation2 + $0x1a] ss:$8 sps:$4 sm:$0xff]   ;;  %v5649_v49 = vld [vmem:[#allocation2 + $0xb] ss:$8 sps:$4 sm:$0xff]  }
 0x105   : > { %5420 = vmatpush3.bf16.msk.msra.mxu0 %vm5874_vm3, %v5415_v26  ;;  %5082 = vmatprep.mubr.msk.f32.mxu0 %vm487_vm4, %v5630_v1  ;;  %v5635_v14 = vld [vmem:[#allocation2 + $0x12] ss:$8 sps:$4 sm:$0xff]   ;;  %v5640_v25 = vld [vmem:[#allocation2 + $0x21] ss:$8 sps:$4 sm:$0xff]  }
 0x106   : > { %5429 = vmatprep.subr.msk.bf16.mxu0 %vm5874_vm3, %v5427_v62  ;;  %v5638_v23 = vld [vmem:[#allocation2 + $0x11] ss:$8 sps:$4 sm:$0xff]   ;;  %v5644_v35 = vld [vmem:[#allocation2 + $0x23] ss:$8 sps:$4 sm:$0xff]  }
 0x107   : > { %v5639_v26 = vld [vmem:[#allocation2 + $0x13] ss:$8 sps:$4 sm:$0xff]   ;;  %v5655_v1 = vld [vmem:[#allocation2 + $0x20] ss:$8 sps:$4 sm:$0xff]   ;;  %v5673_v37 = vld [vmem:[#allocation2 + $0x24] ss:$8 sps:$4 sm:$0xff]  }
 0x108   : > { %5041 = vmatmul.mubr.msk.f32.vlgmr.msra.gmra.mrb[0].mxu1 %vm487_vm4, %v5631_v4  ;;  %5083 = vmatmul.mubr.msk.f32.vlgmr.msra.gmra.mrb[10].mxu0 %vm487_vm4, %v5632_v5  ;;  %v5642_v33 = vld [vmem:[#allocation2 + $0x13] ss:$8 sps:$4 sm:$0xff]   ;;  %v4697_v4 = vld [vmem:[%s6590_s3 + $0x108] sm:$0x3]  ;;  %v5659_v12 = vld [vmem:[#allocation2 + $0x22] ss:$8 sps:$4 sm:$0xff]  }
 0x109   : > { %5390 = vmatpush3.bf16.msk.msra.mxu1 %vm5874_vm3, %v5385_v56  ;;  %5047 = vmatprep.mubr.msk.f32.mxu1 %vm487_vm4, %v5633_v8  ;;  %v5646_v43 = vld [vmem:[#allocation2 + $0x18] ss:$8 sps:$4 sm:$0xff]   ;;  %v5648_v46 = vld [vmem:[#allocation2 + $0x28] ss:$8 sps:$4 sm:$0xff]   ;;  %v5654_v63 = vld [vmem:[#allocation2 + $0x1c] ss:$8 sps:$4 sm:$0xff]  }
 0x10a   : > { %5432 = vmatpush3.bf16.msk.msra.mxu0 %vm5874_vm3, %v5427_v62  ;;  %5096 = vmatprep.mubr.msk.f32.mxu0 %vm487_vm4, %v5634_v13  ;;  %v5647_v45 = vld [vmem:[#allocation2 + $0x19] ss:$8 sps:$4 sm:$0xff]   ;;  %v4721_v51 = vld [vmem:[%s6590_s3 + $0x150] sm:$0xff] }
 0x10b   : > { %5393 = vmatprep.subr.msk.bf16.mxu1 %vm5874_vm3, %v5391_v9  ;;  %5441 = vmatprep.subr.msk.bf16.mxu0 %vm5874_vm3, %v5439_v10  ;;  %v5650_v53 = vld [vmem:[#allocation2 + $0x1a] ss:$8 sps:$4 sm:$0xff]   ;;  %v5652_v56 = vld [vmem:[#allocation2 + $0x2a] ss:$8 sps:$4 sm:$0xff]   ;;  %v4732_v62 = vld [vmem:[%s6590_s3 + $0x178] sm:$0x3]  ;;  %v5499_v0 = vpack.c.bf16 %v4722_v52, %v4721_v51 }
 0x10c   : > { %5048 = vmatmul.mubr.msk.f32.vlgmr.msra.gmra.mrb[2].mxu1 %vm487_vm4, %v5635_v14  ;;  %v5651_v55 = vld [vmem:[#allocation2 + $0x1b] ss:$8 sps:$4 sm:$0xff]   ;;  %v4731_v61 = vld [vmem:[%s6590_s3 + $0x170] sm:$0xff]  ;;  %v5469_v14 = vpack.c.bf16 %v4697_v4, %v4696_v3 }
 0x10d   : > { %5097 = vmatmul.mubr.msk.f32.vlgmr.msra.gmra.mrb[12].mxu0 %vm487_vm4, %v5636_v15  ;;  %5396 = vmatpush3.bf16.msk.msra.mxu1 %vm5874_vm3, %v5391_v9  ;;  %v5653_v59 = vld [vmem:[#allocation2 + $0x10] ss:$8 sps:$4 sm:$0xff]   ;;  %v5656_v2 = vld [vmem:[#allocation2 + $0x2c] ss:$8 sps:$4 sm:$0xff]   ;;  %v5511_v8 = vpack.c.bf16 %v4732_v62, %v4731_v61 }
 0x10e   : > { %5054 = vmatprep.mubr.msk.f32.mxu1 %vm487_vm4, %v5637_v19  ;;  %5444 = vmatpush3.bf16.msk.msra.mxu0 %vm5874_vm3, %v5439_v10  ;;  %v5657_v5 = vld [vmem:[#allocation2 + $0x12] ss:$8 sps:$4 sm:$0xff]   ;;  %v5658_v7 = vld [vmem:[#allocation2 + $0x21] ss:$8 sps:$4 sm:$0xff]  }
 0x10f   : > { %5110 = vmatprep.mubr.msk.f32.mxu0 %vm487_vm4, %v5638_v23  ;;  %5399 = vmatprep.subr.msk.bf16.mxu1 %vm5874_vm3, %v5397_v20  ;;  %v5660_v9 = vld [vmem:[#allocation2 + $0x31] ss:$8 sps:$4 sm:$0xff]   ;;  %v4706_v10 = vld [vmem:[%s6590_s3 + $0x120] sm:$0xff] }
 0x110   : > { %5055 = vmatmul.mubr.msk.f32.vlgmr.msra.gmra.mrb[4].mxu1 %vm487_vm4, %v5639_v26  ;;  %5453 = vmatprep.subr.msk.bf16.mxu0 %vm5874_vm3, %v5451_v24  ;;  %v5661_v13 = vld [vmem:[#allocation2 + $0x14] ss:$8 sps:$4 sm:$0xff]   ;;  %v5662_v15 = vld [vmem:[#allocation2 + $0x23] ss:$8 sps:$4 sm:$0xff]   ;;  %v5493_v26 = vpack.c.bf16 %v4717_v21, %v4716_v18 }
 0x111   : > { %5111 = vmatmul.mubr.msk.f32.vlgmr.msra.gmra.mrb[14].mxu0 %vm487_vm4, %v5640_v25  ;;  %5402 = vmatpush3.bf16.msk.msra.mxu1 %vm5874_vm3, %v5397_v20  ;;  %v5664_v16 = vld [vmem:[#allocation2 + $0x33] ss:$8 sps:$4 sm:$0xff]   ;;  %v5663_v19 = vld [vmem:[#allocation2 + $0x24] ss:$8 sps:$4 sm:$0xff]   ;;  %v5481_v20 = vpack.c.bf16 %v4707_v11, %v4706_v10 }
 0x112   : > { %5061 = vmatprep.mubr.msk.f32.mxu1 %vm487_vm4, %v5641_v29  ;;  %5456 = vmatpush3.bf16.msk.msra.mxu0 %vm5874_vm3, %v5451_v24  ;;  %v5665_v22 = vld [vmem:[#allocation2 + $0x19] ss:$8 sps:$4 sm:$0xff]   ;;  %v4727_v24 = vld [vmem:[%s6590_s3 + $0x168] sm:$0x3]  ;;  %v5668_v28 = vld [vmem:[#allocation2 + $0x2b] ss:$8 sps:$4 sm:$0xff]  }
 0x113   : > { %5124 = vmatprep.mubr.msk.f32.mxu0 %vm487_vm4, %v5642_v33  ;;  %5411 = vmatprep.subr.msk.bf16.mxu1 %vm5874_vm3, %v5409_v30  ;;  %v4726_v23 = vld [vmem:[%s6590_s3 + $0x160] sm:$0xff]  ;;  %v5666_v25 = vld [vmem:[#allocation2 + $0x29] ss:$8 sps:$4 sm:$0xff]  }
 0x114   : > { %5062 = vmatmul.mubr.msk.f32.vlgmr.msra.gmra.mrb[6].mxu1 %vm487_vm4, %v5643_v36  ;;  %5465 = vmatprep.subr.msk.bf16.mxu0 %vm5874_vm3, %v5463_v34  ;;  %v5667_v27 = vld [vmem:[#allocation2 + $0x1b] ss:$8 sps:$4 sm:$0xff]   ;;  %v5505_v29 = vpack.c.bf16 %v4727_v24, %v4726_v23 }
 0x115   : > { %5125 = vmatmul.mubr.msk.f32.vlgmr.msra.gmra.mrb[16].mxu0 %vm487_vm4, %v5644_v35  ;;  %5414 = vmatpush3.bf16.msk.msra.mxu1 %vm5874_vm3, %v5409_v30  ;;  %v5669_v30 = vld [vmem:[#allocation2 + $0x20] ss:$8 sps:$4 sm:$0xff]   ;;  %v5670_v33 = vld [vmem:[#allocation2 + $0x30] ss:$8 sps:$4 sm:$0xff]   ;;  %v5674_v38 = vld [vmem:[#allocation2 + $0x34] ss:$8 sps:$4 sm:$0xff]  }
 0x116   : > { %5075 = vmatprep.mubr.msk.f32.mxu1 %vm487_vm4, %v5645_v39  ;;  %5468 = vmatpush3.bf16.msk.msra.mxu0 %vm5874_vm3, %v5463_v34  ;;  %v5517_v34 = vpack.c.bf16 %v4737_v32, %v4736_v31  ;;  %v5671_v35 = vld [vmem:[#allocation2 + $0x22] ss:$8 sps:$4 sm:$0xff]   ;;  %v5672_v36 = vld [vmem:[#allocation2 + $0x32] ss:$8 sps:$4 sm:$0xff]  }
 0x117   : > { %5138 = vmatprep.mubr.msk.f32.mxu0 %vm487_vm4, %v5646_v43  ;;  %5423 = vmatprep.subr.msk.bf16.mxu1 %vm5874_vm3, %v5421_v40  ;;  %v4742_v39 = vld [vmem:[%s6592_s5 + $0x18] sm:$0xff] }
 0x118   : > { %5076 = vmatmul.mubr.msk.f32.vlgmr.msra.gmra.mrb[8].mxu1 %vm487_vm4, %v5647_v45  ;;  %5477 = vmatprep.subr.msk.bf16.mxu0 %vm5874_vm3, %v5475_v44  ;;  %v4750_v43 = vld [vmem:[%s6592_s5 + $0x38] sm:$0xff]  ;;  %v5742_v45 = vmov 0.0  }
 0x119   : > { %5139 = vmatmul.mubr.msk.f32.vlgmr.msra.gmra.mrb[18].mxu0 %vm487_vm4, %v5648_v46  ;;  %5426 = vmatpush3.bf16.msk.msra.mxu1 %vm5874_vm3, %v5421_v40  ;;  %v4743_v40 = vld [vmem:[%s6592_s5 + $0x20] sm:$0xff]  ;;  %v4744_v46 = vld [vmem:[%s6592_s5 + $0x28] sm:$0xf] }
 0x11a   : > { %5089 = vmatprep.mubr.msk.f32.mxu1 %vm487_vm4, %v5649_v49  ;;  %5480 = vmatpush3.bf16.msk.msra.mxu0 %vm5874_vm3, %v5475_v44  ;;  %v5524_v17 = vpack.c.bf16 %v4743_v40, %v4742_v39  ;;  %v5530_v44 = vpack.c.bf16 %v4750_v43, %v4749_v41 }
 0x11b   : > { %5152 = vmatprep.mubr.msk.f32.mxu0 %vm487_vm4, %v5650_v53  ;;  %5435 = vmatprep.subr.msk.bf16.mxu1 %vm5874_vm3, %v5433_v50 }
 0x11c   : > { %5090 = vmatmul.mubr.msk.f32.vlgmr.msra.gmra.mrb[10].mxu1 %vm487_vm4, %v5651_v55  ;;  %5489 = vmatprep.subr.msk.bf16.mxu0 %vm5874_vm3, %v5487_v54 }
 0x11d   : > { %5153 = vmatmul.mubr.msk.f32.vlgmr.msra.gmra.mrb[20].mxu0 %vm487_vm4, %v5652_v56  ;;  %5438 = vmatpush3.bf16.msk.msra.mxu1 %vm5874_vm3, %v5433_v50 }
 0x11e   : > { %5103 = vmatprep.mubr.msk.f32.mxu1 %vm487_vm4, %v5653_v59  ;;  %5492 = vmatpush3.bf16.msk.msra.mxu0 %vm5874_vm3, %v5487_v54 }
 0x11f   : > { %5166 = vmatprep.mubr.msk.f32.mxu0 %vm487_vm4, %v5654_v63  ;;  %5447 = vmatprep.subr.msk.bf16.mxu1 %vm5874_vm3, %v5445_v60 }
 0x120   : > { %5104 = vmatmul.mubr.msk.f32.vlgmr.msra.gmra.mrb[12].mxu1 %vm487_vm4, %v5655_v1  ;;  %5501 = vmatprep.subr.msk.bf16.mxu0 %vm5874_vm3, %v5499_v0 }
 0x121   : > { %5167 = vmatmul.mubr.msk.f32.vlgmr.msra.gmra.mrb[22].mxu0 %vm487_vm4, %v5656_v2  ;;  %5450 = vmatpush3.bf16.msk.msra.mxu1 %vm5874_vm3, %v5445_v60 }
 0x122   : > { %5117 = vmatprep.mubr.msk.f32.mxu1 %vm487_vm4, %v5657_v5  ;;  %5504 = vmatpush3.bf16.msk.msra.mxu0 %vm5874_vm3, %v5499_v0 }
 0x123   : > { %5180 = vmatprep.mubr.msk.f32.mxu0 %vm487_vm4, %v5658_v7  ;;  %5459 = vmatprep.subr.msk.bf16.mxu1 %vm5874_vm3, %v5457_v6 }
 0x124   : > { %5118 = vmatmul.mubr.msk.f32.vlgmr.msra.gmra.mrb[14].mxu1 %vm487_vm4, %v5659_v12  ;;  %5513 = vmatprep.subr.msk.bf16.mxu0 %vm5874_vm3, %v5511_v8 }
 0x125   : > { %5181 = vmatmul.mubr.msk.f32.vlgmr.msra.gmra.mrb[24].mxu0 %vm487_vm4, %v5660_v9  ;;  %5462 = vmatpush3.bf16.msk.msra.mxu1 %vm5874_vm3, %v5457_v6 }
 0x126   : > { %5131 = vmatprep.mubr.msk.f32.mxu1 %vm487_vm4, %v5661_v13  ;;  %5516 = vmatpush3.bf16.msk.msra.mxu0 %vm5874_vm3, %v5511_v8 }
 0x127   : > { %5194 = vmatprep.mubr.msk.f32.mxu0 %vm487_vm4, %v5662_v15  ;;  %5471 = vmatprep.subr.msk.bf16.mxu1 %vm5874_vm3, %v5469_v14 }
 0x128   : > { %5132 = vmatmul.mubr.msk.f32.vlgmr.msra.gmra.mrb[16].mxu1 %vm487_vm4, %v5663_v19  ;;  %5529 = vmatprep.subr.bf16.mxu0 %v5740_v42 }
 0x129   : > { %5195 = vmatmul.mubr.msk.f32.vlgmr.msra.gmra.mrb[26].mxu0 %vm487_vm4, %v5664_v16  ;;  %5474 = vmatpush3.bf16.msk.msra.mxu1 %vm5874_vm3, %v5469_v14 }
 0x12a   : > { %5145 = vmatprep.mubr.msk.f32.mxu1 %vm487_vm4, %v5665_v22  ;;  %5483 = vmatprep.subr.msk.bf16.mxu1 %vm5874_vm3, %v5481_v20 }
 0x12b   : > { %5228 = vmatprep.mubr.msk.f32.mxu0 %vm5741_vm5, %v5742_v45  ;;  %5531 = vmatpush3.bf16.msra.mxu0 %v5530_v44 }
 0x12c   : > { %5146 = vmatmul.mubr.msk.f32.vlgmr.msra.gmra.mrb[18].mxu1 %vm487_vm4, %v5666_v25  ;;  %5226 = vmatprep.subr.mxu0 %v5742_v45 }
 0x12d   : > { %5486 = vmatpush3.bf16.msk.msra.mxu1 %vm5874_vm3, %v5481_v20  ;;  %5159 = vmatprep.mubr.msk.f32.mxu1 %vm487_vm4, %v5667_v27 }
 0x12e   : > { %5495 = vmatprep.subr.msk.bf16.mxu1 %vm5874_vm3, %v5493_v26 }
 0x12f   : > { %5227 = vmatpush3.msk.msra.mxu0 %vm3144_vm6, %v4751_v47 }
 0x130   : > { %5160 = vmatmul.mubr.msk.f32.vlgmr.msra.gmra.mrb[20].mxu1 %vm487_vm4, %v5668_v28  ;;  %5535 = vmatprep.subr.bf16.mxu0 %v5740_v42 }
 0x131   : > { %5498 = vmatpush3.bf16.msk.msra.mxu1 %vm5874_vm3, %v5493_v26  ;;  %5173 = vmatprep.mubr.msk.f32.mxu1 %vm487_vm4, %v5669_v30 }
 0x132   : > { %5507 = vmatprep.subr.msk.bf16.mxu1 %vm5874_vm3, %v5505_v29 }
 0x134   : > { %5174 = vmatmul.mubr.msk.f32.vlgmr.msra.gmra.mrb[22].mxu1 %vm487_vm4, %v5670_v33 }
 0x135   : > { %5510 = vmatpush3.bf16.msk.msra.mxu1 %vm5874_vm3, %v5505_v29  ;;  %5187 = vmatprep.mubr.msk.f32.mxu1 %vm487_vm4, %v5671_v35 }
 0x136   : > { %5519 = vmatprep.subr.msk.bf16.mxu1 %vm5874_vm3, %v5517_v34 }
 0x138   : > { %5188 = vmatmul.mubr.msk.f32.vlgmr.msra.gmra.mrb[24].mxu1 %vm487_vm4, %v5672_v36 }
 0x139   : > { %5522 = vmatpush3.bf16.msk.msra.mxu1 %vm5874_vm3, %v5517_v34  ;;  %5201 = vmatprep.mubr.msk.f32.mxu1 %vm487_vm4, %v5673_v37 }
 0x13a   : > { %5523 = vmatprep.subr.bf16.mxu1 %v5740_v42 }
 0x13c   : > { %5202 = vmatmul.mubr.msk.f32.vlgmr.msra.gmra.mrb[26].mxu1 %vm487_vm4, %v5674_v38 }
 0x13d   : > { %5210 = vmatprep.mubr.msk.f32.mxu1 %vm5741_vm5, %v5742_v45  ;;  %5525 = vmatpush3.bf16.msra.mxu1 %v5524_v17 }
 0x13e   : > { %5208 = vmatprep.subr.mxu1 %v5742_v45 }
 0x141   : > { %5209 = vmatpush3.msk.msra.mxu1 %vm3144_vm6, %v4744_v46 }
 0x142   : > { %5526 = vmatprep.subr.bf16.mxu1 %v5740_v42 }
 0x1d7   : > { %v5070_v48 = vpop.f32.mrb[8].mxu0 }
 0x1d8   : > { %v1094_v49 = vpop.f32.mrb[9].mxu0  ;;  %v1106_v21 = vcombine.high %v5070_v48, %v5070_v48 }
 0x1d9   : > { %v1105_v24 = vcombine.high %v1094_v49, %v1094_v49 }
 0x1db   : > { %v5042_v50 = vpop.f32.mrb[0].mxu1  ;;  %v5084_v51 = vpop.f32.mrb[10].mxu0 }
 0x1dc   : > { %v677_v52 = vpop.f32.mrb[1].mxu1  ;;  %v1304_v53 = vpop.f32.mrb[11].mxu0  ;;  %v689_v55 = vcombine.high %v5042_v50, %v5042_v50  ;;  %v1316_v37 = vcombine.high %v5084_v51, %v5084_v51 }
 0x1dd   : > { %v688_v60 = vcombine.high %v677_v52, %v677_v52  ;;  %v1315_v40 = vcombine.high %v1304_v53, %v1304_v53 }
 0x1df   : > { %v5049_v54 = vpop.f32.mrb[2].mxu1 }
 0x1e0   : > { %v790_v56 = vcombine.high %v5049_v54, %v5049_v54  ;;  %v795_v57 = vadd.f32 %v5049_v54, %v5042_v50  ;;  %v6213_v58 = vpop.f32.mrb[12].mxu0  ;;  %v778_v59 = vpop.f32.mrb[3].mxu1 }
 0x1e1   : > { %v789_v61 = vcombine.high %v778_v59, %v778_v59  ;;  %v793_v62 = vadd.f32 %v778_v59, %v677_v52  ;;  %v6215_v63 = vpop.f32.mrb[13].mxu0 }
 0x1e2   : > { %v796_v0 = vadd.f32 %v790_v56, %v689_v55  ;;  %v1526_v56 = vcombine.high %v6213_v58, %v6213_v58 }
 0x1e3   : > { %v794_v1 = vadd.f32 %v789_v61, %v688_v60  ;;  %v5056_v2 = vpop.f32.mrb[4].mxu1 }
 0x1e4   : > { %v895_v3 = vcombine.high %v5056_v2, %v5056_v2  ;;  %v900_v4 = vadd.f32 %v5056_v2, %v795_v57  ;;  %v883_v5 = vpop.f32.mrb[5].mxu1  ;;  %v6217_v6 = vpop.f32.mrb[14].mxu0 }
 0x1e5   : > { %v894_v7 = vcombine.high %v883_v5, %v883_v5  ;;  %v898_v8 = vadd.f32 %v883_v5, %v793_v62  ;;  %v6219_v9 = vpop.f32.mrb[15].mxu0 }
 0x1e6   : > { %v901_v10 = vadd.f32 %v895_v3, %v796_v0 }
 0x1e7   : > { %v899_v11 = vadd.f32 %v894_v7, %v794_v1  ;;  %v5063_v12 = vpop.f32.mrb[6].mxu1 }
 0x1e8   : > { %v1000_v13 = vcombine.high %v5063_v12, %v5063_v12  ;;  %v1005_v14 = vadd.f32 %v5063_v12, %v900_v4  ;;  %v6221_v15 = vpop.f32.mrb[16].mxu0  ;;  %v988_v16 = vpop.f32.mrb[7].mxu1 }
 0x1e9   : > { %v999_v18 = vcombine.high %v988_v16, %v988_v16  ;;  %v1003_v19 = vadd.f32 %v988_v16, %v898_v8  ;;  %v6223_v20 = vpop.f32.mrb[17].mxu0 }
 0x1ea   : > { %v1006_v22 = vadd.f32 %v1000_v13, %v901_v10  ;;  %v1111_v23 = vadd.f32 %v5070_v48, %v1005_v14 }
 0x1eb   : > { %v1004_v25 = vadd.f32 %v999_v18, %v899_v11  ;;  %v5077_v26 = vpop.f32.mrb[8].mxu1  ;;  %v1109_v27 = vadd.f32 %v1094_v49, %v1003_v19 }
 0x1ec   : > { %v1112_v28 = vadd.f32 %v1106_v21, %v1006_v22  ;;  %v1211_v29 = vcombine.high %v5077_v26, %v5077_v26  ;;  %v1216_v30 = vadd.f32 %v5077_v26, %v1111_v23  ;;  %v6225_v31 = vpop.f32.mrb[18].mxu0  ;;  %v1199_v32 = vpop.f32.mrb[9].mxu1 }
 0x1ed   : > { %v1110_v33 = vadd.f32 %v1105_v24, %v1004_v25  ;;  %v1210_v34 = vcombine.high %v1199_v32, %v1199_v32  ;;  %v1214_v35 = vadd.f32 %v1199_v32, %v1109_v27  ;;  %v6227_v36 = vpop.f32.mrb[19].mxu0 }
 0x1ee   : > { %v1217_v38 = vadd.f32 %v1211_v29, %v1112_v28  ;;  %v1321_v39 = vadd.f32 %v5084_v51, %v1216_v30 }
 0x1ef   : > { %v1215_v41 = vadd.f32 %v1210_v34, %v1110_v33  ;;  %v5091_v17 = vpop.f32.mrb[10].mxu1  ;;  %v1319_v43 = vadd.f32 %v1304_v53, %v1214_v35  ;;  %v1525_v53 = vcombine.high %v6215_v63, %v6215_v63 }
 0x1f0   : > { %v1322_v44 = vadd.f32 %v1316_v37, %v1217_v38  ;;  %v1421_v46 = vcombine.high %v5091_v17, %v5091_v17  ;;  %v1426_v47 = vadd.f32 %v5091_v17, %v1321_v39  ;;  %v6229_v48 = vpop.f32.mrb[20].mxu0  ;;  %v1409_v49 = vpop.f32.mrb[11].mxu1 }
 0x1f1   : > { %v1320_v50 = vadd.f32 %v1315_v40, %v1215_v41  ;;  %v1420_v52 = vcombine.high %v1409_v49, %v1409_v49  ;;  %v1424_v54 = vadd.f32 %v1409_v49, %v1319_v43  ;;  %v6231_v55 = vpop.f32.mrb[21].mxu0 }
 0x1f2   : > { %v1427_v57 = vadd.f32 %v1421_v46, %v1322_v44  ;;  %v1531_v51 = vadd.f32 %v6213_v58, %v1426_v47  ;;  %v1737_v58 = vcombine.high %v6217_v6, %v6217_v6 }
 0x1f3   : > { %v1425_v59 = vadd.f32 %v1420_v52, %v1320_v50  ;;  %v5105_v60 = vpop.f32.mrb[12].mxu1  ;;  %v1529_v61 = vadd.f32 %v6215_v63, %v1424_v54  ;;  %v1736_v63 = vcombine.high %v6219_v9, %v6219_v9 }
 0x1f4   : > { %v1532_v62 = vadd.f32 %v1526_v56, %v1427_v57  ;;  %v1632_v0 = vcombine.high %v5105_v60, %v5105_v60  ;;  %v1637_v1 = vadd.f32 %v5105_v60, %v1531_v51  ;;  %v6239_v2 = vpop.f32.mrb[22].mxu0  ;;  %v1620_v3 = vpop.f32.mrb[13].mxu1 }
 0x1f5   : > { %v1530_v4 = vadd.f32 %v1525_v53, %v1425_v59  ;;  %v1631_v5 = vcombine.high %v1620_v3, %v1620_v3  ;;  %v1635_v7 = vadd.f32 %v1620_v3, %v1529_v61  ;;  %v6241_v8 = vpop.f32.mrb[23].mxu0  ;;  %v2368_v59 = vcombine.high %v6229_v48, %v6229_v48 }
 0x1f6   : > { %v1638_v10 = vadd.f32 %v1632_v0, %v1532_v62  ;;  %v1742_v11 = vadd.f32 %v6217_v6, %v1637_v1  ;;  %v1947_v6 = vcombine.high %v6221_v15, %v6221_v15  ;;  %v2367_v61 = vcombine.high %v6231_v55, %v6231_v55 }
 0x1f7   : > { %v1636_v12 = vadd.f32 %v1631_v5, %v1530_v4  ;;  %v5119_v13 = vpop.f32.mrb[14].mxu1  ;;  %v1740_v14 = vadd.f32 %v6219_v9, %v1635_v7  ;;  %v1946_v9 = vcombine.high %v6223_v20, %v6223_v20 }
 0x1f8   : > { %v1743_v16 = vadd.f32 %v1737_v58, %v1638_v10  ;;  %v1842_v18 = vcombine.high %v5119_v13, %v5119_v13  ;;  %v1847_v19 = vadd.f32 %v5119_v13, %v1742_v11  ;;  %v1830_v21 = vpop.f32.mrb[15].mxu1  ;;  %v6249_v22 = vpop.f32.mrb[24].mxu0  ;;  %v2578_v11 = vcombine.high %v6239_v2, %v6239_v2 }
 0x1f9   : > { %v1741_v23 = vadd.f32 %v1736_v63, %v1636_v12  ;;  %v1841_v24 = vcombine.high %v1830_v21, %v1830_v21  ;;  %v1845_v25 = vadd.f32 %v1830_v21, %v1740_v14  ;;  %v6251_v26 = vpop.f32.mrb[25].mxu0  ;;  %v2577_v12 = vcombine.high %v6241_v8, %v6241_v8 }
 0x1fa   : > { %v1848_v27 = vadd.f32 %v1842_v18, %v1743_v16  ;;  %v1952_v28 = vadd.f32 %v6221_v15, %v1847_v19  ;;  %v2158_v15 = vcombine.high %v6225_v31, %v6225_v31 }
 0x1fb   : > { %v1846_v29 = vadd.f32 %v1841_v24, %v1741_v23  ;;  %v5133_v30 = vpop.f32.mrb[16].mxu1  ;;  %v1950_v32 = vadd.f32 %v6223_v20, %v1845_v25  ;;  %v2157_v20 = vcombine.high %v6227_v36, %v6227_v36 }
 0x1fc   : > { %v1953_v33 = vadd.f32 %v1947_v6, %v1848_v27  ;;  %v2052_v34 = vcombine.high %v5133_v30, %v5133_v30  ;;  %v2057_v35 = vadd.f32 %v5133_v30, %v1952_v28  ;;  %v6259_v37 = vpop.f32.mrb[26].mxu0  ;;  %v2040_v38 = vpop.f32.mrb[17].mxu1  ;;  %v2789_v6 = vcombine.high %v6249_v22, %v6249_v22 }
 0x1fd   : > { %v1951_v39 = vadd.f32 %v1946_v9, %v1846_v29  ;;  %v2051_v40 = vcombine.high %v2040_v38, %v2040_v38  ;;  %v2055_v41 = vadd.f32 %v2040_v38, %v1950_v32  ;;  %v6261_v17 = vpop.f32.mrb[27].mxu0  ;;  %v2788_v28 = vcombine.high %v6251_v26, %v6251_v26 }
 0x1fe   : > { %v2058_v43 = vadd.f32 %v2052_v34, %v1953_v33  ;;  %v2163_v44 = vadd.f32 %v6225_v31, %v2057_v35 }
 0x1ff   : > { %v2056_v46 = vadd.f32 %v2051_v40, %v1951_v39  ;;  %v5147_v47 = vpop.f32.mrb[18].mxu1  ;;  %v2161_v49 = vadd.f32 %v6227_v36, %v2055_v41  ;;  %v2999_v40 = vcombine.high %v6259_v37, %v6259_v37 }
 0x200   : > { %v2164_v50 = vadd.f32 %v2158_v15, %v2058_v43  ;;  %v2263_v52 = vcombine.high %v5147_v47, %v5147_v47  ;;  %v2268_v54 = vadd.f32 %v5147_v47, %v2163_v44  ;;  %v2251_v56 = vpop.f32.mrb[19].mxu1  ;;  %v2998_v15 = vcombine.high %v6261_v17, %v6261_v17 }
 0x201   : > { %v2162_v57 = vadd.f32 %v2157_v20, %v2056_v46  ;;  %v2262_v51 = vcombine.high %v2251_v56, %v2251_v56  ;;  %v2266_v53 = vadd.f32 %v2251_v56, %v2161_v49 }
 0x202   : > { %v2269_v60 = vadd.f32 %v2263_v52, %v2164_v50  ;;  %v2373_v31 = vadd.f32 %v6229_v48, %v2268_v54 }
 0x203   : > { %v2267_v62 = vadd.f32 %v2262_v51, %v2162_v57  ;;  %v5161_v0 = vpop.f32.mrb[20].mxu1  ;;  %v2371_v36 = vadd.f32 %v6231_v55, %v2266_v53 }
 0x204   : > { %v2374_v1 = vadd.f32 %v2368_v59, %v2269_v60  ;;  %v2473_v3 = vcombine.high %v5161_v0, %v5161_v0  ;;  %v2478_v4 = vadd.f32 %v5161_v0, %v2373_v31  ;;  %v2461_v5 = vpop.f32.mrb[21].mxu1 }
 0x205   : > { %v2372_v7 = vadd.f32 %v2367_v61, %v2267_v62  ;;  %v2472_v58 = vcombine.high %v2461_v5, %v2461_v5  ;;  %v2476_v10 = vadd.f32 %v2461_v5, %v2371_v36  ;;  %v3133_v36 = vld [vmem:[%s6592_s5 + $0x8] sm:$0xff] }
 0x206   : > { %v2479_v63 = vadd.f32 %v2473_v3, %v2374_v1  ;;  %v2583_v48 = vadd.f32 %v6239_v2, %v2478_v4  ;;  %v4759_v1 = vld [vmem:[%s6592_s5 + $0x60] sm:$0xff]  ;;  %v4760_v3 = vld [vmem:[%s6592_s5 + $0x68] sm:$0xff] }
 0x207   : > { %v2477_v13 = vadd.f32 %v2472_v58, %v2372_v7  ;;  %v5175_v14 = vpop.f32.mrb[22].mxu1  ;;  %v2581_v55 = vadd.f32 %v6241_v8, %v2476_v10  ;;  %v5536_v5 = vpack.c.bf16 %v4760_v3, %v4759_v1  ;;  %v4754_v10 = vld [vmem:[%s6592_s5 + $0x48] sm:$0xff] }
 0x208   : > { %v2584_v16 = vadd.f32 %v2578_v11, %v2479_v63  ;;  %v2684_v18 = vcombine.high %v5175_v14, %v5175_v14  ;;  %v2689_v19 = vadd.f32 %v5175_v14, %v2583_v48  ;;  %v2672_v21 = vpop.f32.mrb[23].mxu1  ;;  %v4755_v11 = vld [vmem:[%s6592_s5 + $0x50] sm:$0xff]  ;;  %v4770_v48 = vld [vmem:[%s6592_s5 + $0x98] sm:$0xff]  ;;  %v4814_v3 = vld [vmem:[%s6592_s5 + $0x168] sm:$0xff] }
 0x209   : > { %v2582_v23 = vadd.f32 %v2577_v12, %v2477_v13  ;;  %v2683_v24 = vcombine.high %v2672_v21, %v2672_v21  ;;  %v2687_v25 = vadd.f32 %v2672_v21, %v2581_v55  ;;  %v4769_v63 = vld [vmem:[%s6592_s5 + $0x90] sm:$0xff]  ;;  %v5533_v14 = vpack.c.bf16 %v4755_v11, %v4754_v10  ;;  %v4765_v21 = vld [vmem:[%s6592_s5 + $0x80] sm:$0xff]  ;;  %v4816_v10 = vld [vmem:[%s6592_s5 + $0x178] sm:$0xf] }
 0x20a   : > { %v2690_v27 = vadd.f32 %v2684_v18, %v2584_v16  ;;  %v2794_v2 = vadd.f32 %v6249_v22, %v2689_v19  ;;  %v3134_v12 = vld [vmem:[%s6592_s5 + $0x10] sm:$0xf]  ;;  %v5542_v55 = vpack.c.bf16 %v4770_v48, %v4769_v63  ;;  %v4764_v19 = vld [vmem:[%s6592_s5 + $0x78] sm:$0xff]  ;;  %v4448_v63 = vld [vmem:[%s6594_s7] sm:$0xff] }
 0x20b   : > { %v2688_v9 = vadd.f32 %v2683_v24, %v2582_v23  ;;  %v5189_v29 = vpop.f32.mrb[24].mxu1  ;;  %v2792_v8 = vadd.f32 %v6251_v26, %v2687_v25  ;;  %v4741_v26 = vld [vmem:[%s6591_s4] ss:$0 sm:$0xff]  ;;  %v4761_v13 = vld [vmem:[%s6592_s5 + $0x70] sm:$0xf]  ;;  %v4780_v24 = vld [vmem:[%s6592_s5 + $0xc8] sm:$0xff] }
 0x20c   : > { %v2795_v30 = vadd.f32 %v2789_v6, %v2690_v27  ;;  %v2894_v32 = vcombine.high %v5189_v29, %v5189_v29  ;;  %v2899_v33 = vadd.f32 %v5189_v29, %v2794_v2  ;;  %v2882_v34 = vpop.f32.mrb[25].mxu1  ;;  %v4779_v23 = vld [vmem:[%s6592_s5 + $0xc0] sm:$0xff]  ;;  %v4756_v25 = vld [vmem:[%s6592_s5 + $0x58] sm:$0xf]  ;;  %v5539_v27 = vpack.c.bf16 %v4765_v21, %v4764_v19  ;;  %v4774_v29 = vld [vmem:[%s6592_s5 + $0xa8] sm:$0xff] }
 0x20d   : > { %v2793_v35 = vadd.f32 %v2788_v28, %v2688_v9  ;;  %v2893_v38 = vcombine.high %v2882_v34, %v2882_v34  ;;  %v2897_v39 = vadd.f32 %v2882_v34, %v2792_v8  ;;  %v4771_v6 = vld [vmem:[%s6592_s5 + $0xa0] sm:$0xf]  ;;  %v5548_v2 = vpack.c.bf16 %v4780_v24, %v4779_v23  ;;  %v4775_v8 = vld [vmem:[%s6592_s5 + $0xb0] sm:$0xff]  ;;  %v4449_v48 = vld [vmem:[%s6594_s7 + $0x8] sm:$0xff] }
 0x20e   : > { %v2900_v41 = vadd.f32 %v2894_v32, %v2795_v30  ;;  %v3004_v22 = vadd.f32 %v6259_v37, %v2899_v33  ;;  %v4789_v30 = vld [vmem:[%s6592_s5 + $0xf0] sm:$0xff]  ;;  %v4790_v32 = vld [vmem:[%s6592_s5 + $0xf8] sm:$0xff]  ;;  %v4766_v33 = vld [vmem:[%s6592_s5 + $0x88] sm:$0xf] }
 0x20f   : > { %v2898_v43 = vadd.f32 %v2893_v38, %v2793_v35  ;;  %v5203_v44 = vpop.f32.mrb[26].mxu1  ;;  %v3002_v20 = vadd.f32 %v6261_v17, %v2897_v39  ;;  %v3132_v17 = vld [vmem:[%s6592_s5] sm:$0xff]  ;;  %v4781_v34 = vld [vmem:[%s6592_s5 + $0xd0] sm:$0xf]  ;;  %v5545_v35 = vpack.c.bf16 %v4775_v8, %v4774_v29  ;;  %v5554_v38 = vpack.c.bf16 %v4790_v32, %v4789_v30 }
 0x210   : > { %v3005_v46 = vadd.f32 %v2999_v40, %v2900_v41  ;;  %v3104_v47 = vcombine.high %v5203_v44, %v5203_v44  ;;  %v3109_v49 = vadd.f32 %v5203_v44, %v3004_v22  ;;  %v3092_v50 = vpop.f32.mrb[27].mxu1  ;;  %v5527_v4 = vpack.c.bf16 %v3133_v36, %v3132_v17  ;;  %v4784_v41 = vld [vmem:[%s6592_s5 + $0xd8] sm:$0xff]  ;;  %v4785_v22 = vld [vmem:[%s6592_s5 + $0xe0] sm:$0xff]  ;;  %v4454_v21 = vld [vmem:[%s6594_s7 + $0x30] sm:$0x3] }
 0x211   : > { %v3003_v52 = vadd.f32 %v2998_v15, %v2898_v43  ;;  %v3103_v54 = vcombine.high %v3092_v50, %v3092_v50  ;;  %v3107_v56 = vadd.f32 %v3092_v50, %v3002_v20  ;;  %v4799_v15 = vld [vmem:[%s6592_s5 + $0x120] sm:$0xff]  ;;  %v4800_v43 = vld [vmem:[%s6592_s5 + $0x128] sm:$0xff]  ;;  %v4776_v44 = vld [vmem:[%s6592_s5 + $0xb8] sm:$0xf]  ;;  %v5551_v20 = vpack.c.bf16 %v4785_v22, %v4784_v41 }
 0x212   : > { %v3110_v57 = vadd.f32 %v3104_v47, %v3005_v46  ;;  %v3120_v37 = vadd.f32 %v4741_v26, %v3109_v49  ;;  %v5560_v46 = vpack.c.bf16 %v4800_v43, %v4799_v15  ;;  %v4794_v50 = vld [vmem:[%s6592_s5 + $0x108] sm:$0xff] }
 0x213   : > { %v3108_v51 = vadd.f32 %v3103_v54, %v3003_v52  ;;  %v3118_v53 = vadd.f32 %v4741_v26, %v3107_v56  ;;  %v4795_v52 = vld [vmem:[%s6592_s5 + $0x110] sm:$0xff]  ;;  %v4810_v56 = vld [vmem:[%s6592_s5 + $0x158] sm:$0xff] }
 0x214   : > { %v3121_v59 = vadd.f32 %v4741_v26, %v3110_v57  ;;  %v3124_v60 = vmax.f32 %v3120_v37, 0.0  ;;  %v4809_v54 = vld [vmem:[%s6592_s5 + $0x150] sm:$0xff]  ;;  %v4786_v57 = vld [vmem:[%s6592_s5 + $0xe8] sm:$0xf] }
 0x215   : > { %v3119_v31 = vadd.f32 %v4741_v26, %v3108_v51  ;;  %v3122_v61 = vmax.f32 %v3118_v53, 0.0  ;;  %v4791_v26 = vld [vmem:[%s6592_s5 + $0x100] sm:$0xf]  ;;  %v4801_v37 = vld [vmem:[%s6592_s5 + $0x130] sm:$0xf]  ;;  %v5557_v51 = vpack.c.bf16 %v4795_v52, %v4794_v50  ;;  %v5566_v53 = vpack.c.bf16 %v4810_v56, %v4809_v54 }
 0x216   : > { %v3125_v62 = vmax.f32 %v3121_v59, 0.0  ;;  %3129 = vst.msk [vmem:[#allocation3 + $0x8] sm:$0xf] %vm3126_vm7, %v3124_v60 }
 0x217   : > { %v3123_v0 = vmax.f32 %v3119_v31, 0.0  ;;  %3127 = vst.msk [vmem:[#allocation3] sm:$0xf] %vm3126_vm7, %v3122_v61  ;;  %v4804_v31 = vld [vmem:[%s6592_s5 + $0x138] sm:$0xff]  ;;  %v4805_v61 = vld [vmem:[%s6592_s5 + $0x140] sm:$0xff] }
 0x218   : > { %3130 = vst.msk [vmem:[#allocation3 + $0xc] sm:$0xf] %vm3126_vm7, %v3125_v62  ;;  %v4796_v62 = vld [vmem:[%s6592_s5 + $0x118] sm:$0xf]  ;;  %v5563_v17 = vpack.c.bf16 %v4805_v61, %v4804_v31 }
 0x219   : > { %3128 = vst.msk [vmem:[#allocation3 + $0x4] sm:$0xf] %vm3126_vm7, %v3123_v0  ;;  %v4811_v0 = vld [vmem:[%s6592_s5 + $0x160] sm:$0xf] }
 0x21d   : > { %v3788_v40 = vld [vmem:[#allocation3 + $0x8] sm:$0x1]  ;;  %v3952_v49 = vld [vmem:[#allocation3 + $0xa] sm:$0x1]  ;;  %v3870_v59 = vld [vmem:[#allocation3 + $0x9] sm:$0x1] }
 0x21e   : > { %v3135_v7 = vld [vmem:[#allocation3 + $0x1] sm:$0x1]  ;;  %v3294_v58 = vld [vmem:[#allocation3 + $0x2] sm:$0x1]  ;;  %v3131_v16 = vld [vmem:[#allocation3] sm:$0x1] }
 0x21f   : > { %5211 = vmatmul.mubr.msk.f32.vlgmr.msra.gmra.mrb[28].mxu1 %vm3140_vm8, %v3135_v7  ;;  %5229 = vmatmul.mubr.msk.f32.vlgmr.msra.gmra.mrb[28].mxu0 %vm3140_vm8, %v3294_v58  ;;  %v3376_v28 = vld [vmem:[#allocation3 + $0x3] sm:$0x1]  ;;  %v4117_v60 = vld [vmem:[#allocation3 + $0xc] sm:$0x1]  ;;  %v4034_v36 = vld [vmem:[#allocation3 + $0xb] sm:$0x1] }
 0x220   : > { %5528 = vmatpush3.bf16.msra.mxu1 %v5527_v4  ;;  %5537 = vmatpush3.bf16.msra.mxu0 %v5536_v5  ;;  %v3459_v18 = vld [vmem:[#allocation3 + $0x4] sm:$0x1]  ;;  %v3623_v9 = vld [vmem:[#allocation3 + $0x6] sm:$0x1]  ;;  %v3541_v39 = vld [vmem:[#allocation3 + $0x5] sm:$0x1] }
 0x221   : > { %5217 = vmatprep.subr.mxu1 %v5742_v45  ;;  %5244 = vmatprep.subr.mxu0 %v5742_v45  ;;  %v3705_v47 = vld [vmem:[#allocation3 + $0x7] sm:$0x1]  ;;  %v4281_v1 = vld [vmem:[#allocation3 + $0xe] sm:$0x1]  ;;  %v4815_v4 = vld [vmem:[%s6592_s5 + $0x170] sm:$0xff] }
 0x222   : > { %5219 = vmatprep.mubr.msk.f32.mxu1 %vm5741_vm5, %v5742_v45  ;;  %5246 = vmatprep.mubr.msk.f32.mxu0 %vm5741_vm5, %v5742_v45  ;;  %v4806_v5 = vld [vmem:[%s6592_s5 + $0x148] sm:$0xf]  ;;  %v5569_v7 = vpack.c.bf16 %v4815_v4, %v4814_v3  ;;  %v4199_v58 = vld [vmem:[#allocation3 + $0xd] sm:$0x1]  ;;  %v4363_v11 = vld [vmem:[#allocation3 + $0xf] sm:$0x1] }
 0x224   : > { %5218 = vmatpush3.msk.msra.mxu1 %vm3144_vm6, %v3134_v12  ;;  %5245 = vmatpush3.msk.msra.mxu0 %vm3144_vm6, %v4761_v13  ;;  %v4450_v12 = vld [vmem:[%s6594_s7 + $0x10] sm:$0xff]  ;;  %v5572_v13 = vpack.c.bf16 %v4449_v48, %v4448_v63 }
 0x225   : > { %5220 = vmatmul.mubr.msk.f32.vlgmr.msra.gmra.mrb[30].mxu1 %vm3140_vm8, %v3131_v16  ;;  %5532 = vmatprep.subr.bf16.mxu1 %v5740_v42  ;;  %v4452_v16 = vld [vmem:[%s6594_s7 + $0x20] sm:$0xff] }
 0x226   : > { %5247 = vmatmul.mubr.msk.f32.vlgmr.msra.gmra.mrb[30].mxu0 %vm3140_vm8, %v3459_v18  ;;  %5541 = vmatprep.subr.bf16.mxu0 %v5740_v42  ;;  %v4453_v18 = vld [vmem:[%s6594_s7 + $0x28] sm:$0xff] }
 0x227   : > { %5534 = vmatpush3.bf16.msra.mxu1 %v5533_v14  ;;  %5543 = vmatpush3.bf16.msra.mxu0 %v5542_v55  ;;  %v4451_v14 = vld [vmem:[%s6594_s7 + $0x18] sm:$0xff]  ;;  %v5578_v19 = vpack.c.bf16 %v4453_v18, %v4452_v16 }
 0x228   : > { %5235 = vmatprep.subr.mxu1 %v5742_v45  ;;  %5262 = vmatprep.subr.mxu0 %v5742_v45  ;;  %v5575_v55 = vpack.c.bf16 %v4451_v14, %v4450_v12 }
 0x229   : > { %5237 = vmatprep.mubr.msk.f32.mxu1 %vm5741_vm5, %v5742_v45  ;;  %5264 = vmatprep.mubr.msk.f32.mxu0 %vm5741_vm5, %v5742_v45 }
 0x22b   : > { %5236 = vmatpush3.msk.msra.mxu1 %vm3144_vm6, %v4756_v25  ;;  %5263 = vmatpush3.msk.msra.mxu0 %vm3144_vm6, %v4771_v6 }
 0x22c   : > { %5238 = vmatmul.mubr.msk.f32.vlgmr.msra.gmra.mrb[32].mxu1 %vm3140_vm8, %v3376_v28  ;;  %5538 = vmatprep.subr.bf16.mxu1 %v5740_v42 }
 0x22d   : > { %5265 = vmatmul.mubr.msk.f32.vlgmr.msra.gmra.mrb[32].mxu0 %vm3140_vm8, %v3623_v9  ;;  %5547 = vmatprep.subr.bf16.mxu0 %v5740_v42 }
 0x22e   : > { %5540 = vmatpush3.bf16.msra.mxu1 %v5539_v27  ;;  %5549 = vmatpush3.bf16.msra.mxu0 %v5548_v2 }
 0x22f   : > { %5253 = vmatprep.subr.mxu1 %v5742_v45  ;;  %5280 = vmatprep.subr.mxu0 %v5742_v45 }
 0x230   : > { %5255 = vmatprep.mubr.msk.f32.mxu1 %vm5741_vm5, %v5742_v45  ;;  %5282 = vmatprep.mubr.msk.f32.mxu0 %vm5741_vm5, %v5742_v45 }
 0x232   : > { %5254 = vmatpush3.msk.msra.mxu1 %vm3144_vm6, %v4766_v33  ;;  %5281 = vmatpush3.msk.msra.mxu0 %vm3144_vm6, %v4781_v34 }
 0x233   : > { %5256 = vmatmul.mubr.msk.f32.vlgmr.msra.gmra.mrb[34].mxu1 %vm3140_vm8, %v3541_v39  ;;  %5544 = vmatprep.subr.bf16.mxu1 %v5740_v42 }
 0x234   : > { %5283 = vmatmul.mubr.msk.f32.vlgmr.msra.gmra.mrb[34].mxu0 %vm3140_vm8, %v3788_v40  ;;  %5553 = vmatprep.subr.bf16.mxu0 %v5740_v42 }
 0x235   : > { %5546 = vmatpush3.bf16.msra.mxu1 %v5545_v35  ;;  %5555 = vmatpush3.bf16.msra.mxu0 %v5554_v38 }
 0x236   : > { %5271 = vmatprep.subr.mxu1 %v5742_v45  ;;  %5298 = vmatprep.subr.mxu0 %v5742_v45 }
 0x237   : > { %5273 = vmatprep.mubr.msk.f32.mxu1 %vm5741_vm5, %v5742_v45  ;;  %5300 = vmatprep.mubr.msk.f32.mxu0 %vm5741_vm5, %v5742_v45 }
 0x239   : > { %5272 = vmatpush3.msk.msra.mxu1 %vm3144_vm6, %v4776_v44  ;;  %5299 = vmatpush3.msk.msra.mxu0 %vm3144_vm6, %v4791_v26 }
 0x23a   : > { %5274 = vmatmul.mubr.msk.f32.vlgmr.msra.gmra.mrb[36].mxu1 %vm3140_vm8, %v3705_v47  ;;  %5550 = vmatprep.subr.bf16.mxu1 %v5740_v42 }
 0x23b   : > { %5301 = vmatmul.mubr.msk.f32.vlgmr.msra.gmra.mrb[36].mxu0 %vm3140_vm8, %v3952_v49  ;;  %5559 = vmatprep.subr.bf16.mxu0 %v5740_v42 }
 0x23c   : > { %5552 = vmatpush3.bf16.msra.mxu1 %v5551_v20  ;;  %5561 = vmatpush3.bf16.msra.mxu0 %v5560_v46 }
 0x23d   : > { %5289 = vmatprep.subr.mxu1 %v5742_v45  ;;  %5316 = vmatprep.subr.mxu0 %v5742_v45 }
 0x23e   : > { %5291 = vmatprep.mubr.msk.f32.mxu1 %vm5741_vm5, %v5742_v45  ;;  %5318 = vmatprep.mubr.msk.f32.mxu0 %vm5741_vm5, %v5742_v45 }
 0x240   : > { %5290 = vmatpush3.msk.msra.mxu1 %vm3144_vm6, %v4786_v57  ;;  %5317 = vmatpush3.msk.msra.mxu0 %vm3144_vm6, %v4801_v37 }
 0x241   : > { %5292 = vmatmul.mubr.msk.f32.vlgmr.msra.gmra.mrb[38].mxu1 %vm3140_vm8, %v3870_v59  ;;  %5556 = vmatprep.subr.bf16.mxu1 %v5740_v42 }
 0x242   : > { %5319 = vmatmul.mubr.msk.f32.vlgmr.msra.gmra.mrb[38].mxu0 %vm3140_vm8, %v4117_v60  ;;  %5565 = vmatprep.subr.bf16.mxu0 %v5740_v42 }
 0x243   : > { %5558 = vmatpush3.bf16.msra.mxu1 %v5557_v51  ;;  %5567 = vmatpush3.bf16.msra.mxu0 %v5566_v53 }
 0x244   : > { %5307 = vmatprep.subr.mxu1 %v5742_v45  ;;  %5334 = vmatprep.subr.mxu0 %v5742_v45 }
 0x245   : > { %5309 = vmatprep.mubr.msk.f32.mxu1 %vm5741_vm5, %v5742_v45  ;;  %5336 = vmatprep.mubr.msk.f32.mxu0 %vm5741_vm5, %v5742_v45 }
 0x247   : > { %5308 = vmatpush3.msk.msra.mxu1 %vm3144_vm6, %v4796_v62  ;;  %5335 = vmatpush3.msk.msra.mxu0 %vm3144_vm6, %v4811_v0 }
 0x248   : > { %5310 = vmatmul.mubr.msk.f32.vlgmr.msra.gmra.mrb[40].mxu1 %vm3140_vm8, %v4034_v36  ;;  %5562 = vmatprep.subr.bf16.mxu1 %v5740_v42  ;;  %v4445_v36 = vld [vmem:[%s6593_s6] sm:$0x1] }
 0x249   : > { %5337 = vmatmul.mubr.msk.f32.vlgmr.msra.gmra.mrb[40].mxu0 %vm3140_vm8, %v4281_v1  ;;  %5564 = vmatpush3.bf16.msra.mxu1 %v5563_v17 }
 0x24a   : > { %5325 = vmatprep.subr.mxu1 %v5742_v45  ;;  %5327 = vmatprep.mubr.msk.f32.mxu1 %vm5741_vm5, %v5742_v45 }
 0x24b   : > { %5571 = vmatprep.subr.bf16.mxu0 %v5740_v42  ;;  %5362 = vmatprep.mubr.msk.f32.mxu0 %vm5741_vm5, %v5742_v45 }
 0x24c   : > { %5573 = vmatpush3.bf16.msra.mxu0 %v5572_v13 }
 0x24d   : > { %5326 = vmatpush3.msk.msra.mxu1 %vm3144_vm6, %v4806_v5  ;;  %5574 = vmatprep.subr.bf16.mxu0 %v5740_v42 }
 0x24e   : > { %5328 = vmatmul.mubr.msk.f32.vlgmr.msra.gmra.mrb[42].mxu1 %vm3140_vm8, %v4199_v58  ;;  %5568 = vmatprep.subr.bf16.mxu1 %v5740_v42 }
 0x24f   : > { %5570 = vmatpush3.bf16.msra.mxu1 %v5569_v7  ;;  %5345 = vmatprep.mubr.msk.f32.mxu1 %vm5741_vm5, %v5742_v45  ;;  %v4455_v7 = vld [vmem:[%s6595_s8] sm:$0x1] }
 0x250   : > { %5343 = vmatprep.subr.mxu1 %v5742_v45  ;;  %5576 = vmatpush3.bf16.msra.mxu0 %v5575_v55 }
 0x251   : > { %5577 = vmatprep.subr.bf16.mxu0 %v5740_v42 }
 0x253   : > { %5344 = vmatpush3.msk.msra.mxu1 %vm3144_vm6, %v4816_v10 }
 0x254   : > { %5346 = vmatmul.mubr.msk.f32.vlgmr.msra.gmra.mrb[44].mxu1 %vm3140_vm8, %v4363_v11  ;;  %5579 = vmatpush3.bf16.msra.mxu0 %v5578_v19 }
 0x255   : > { %5360 = vmatprep.subr.mxu0 %v5742_v45 }
 0x258   : > { %5361 = vmatpush3.msk.msra.mxu0 %vm519_vm1, %v4454_v21 }
 0x2f2   : > { %v3214_v23 = vpop.f32.mrb[28].mxu1  ;;  %v3371_v42 = vpop.f32.mrb[28].mxu0 }
 0x2f3   : > { %v5212_v24 = vpop.f32.mrb[29].mxu1  ;;  %v5230_v25 = vpop.f32.mrb[29].mxu0 }
 0x2f8   : > { %v3290_v6 = vpop.f32.mrb[30].mxu1 }
 0x2f9   : > { %v3291_v27 = vadd.f32 %v3290_v6, %v3214_v23  ;;  %v3536_v2 = vpop.f32.mrb[30].mxu0  ;;  %v5221_v28 = vpop.f32.mrb[31].mxu1 }
 0x2fa   : > { %v5248_v9 = vpop.f32.mrb[31].mxu0 }
 0x2fb   : > { %v3375_v29 = vadd.f32 %v3371_v42, %v3291_v27 }
 0x2ff   : > { %v3453_v8 = vpop.f32.mrb[32].mxu1 }
 0x300   : > { %v3457_v30 = vadd.f32 %v3453_v8, %v3375_v29  ;;  %v3700_v32 = vpop.f32.mrb[32].mxu0  ;;  %v5239_v45 = vpop.f32.mrb[33].mxu1 }
 0x301   : > { %v5266_v33 = vpop.f32.mrb[33].mxu0 }
 0x302   : > { %v3540_v34 = vadd.f32 %v3536_v2, %v3457_v30 }
 0x306   : > { %v3618_v35 = vpop.f32.mrb[34].mxu1 }
 0x307   : > { %v3622_v38 = vadd.f32 %v3618_v35, %v3540_v34  ;;  %v3865_v39 = vpop.f32.mrb[34].mxu0  ;;  %v5257_v40 = vpop.f32.mrb[35].mxu1 }
 0x308   : > { %v5284_v41 = vpop.f32.mrb[35].mxu0 }
 0x309   : > { %v3704_v22 = vadd.f32 %v3700_v32, %v3622_v38 }
 0x30d   : > { %v3782_v15 = vpop.f32.mrb[36].mxu1 }
 0x30e   : > { %v3786_v43 = vadd.f32 %v3782_v15, %v3704_v22  ;;  %v4029_v44 = vpop.f32.mrb[36].mxu0  ;;  %v5275_v26 = vpop.f32.mrb[37].mxu1 }
 0x30f   : > { %v5302_v20 = vpop.f32.mrb[37].mxu0 }
 0x310   : > { %v3869_v46 = vadd.f32 %v3865_v39, %v3786_v43 }
 0x314   : > { %v3947_v47 = vpop.f32.mrb[38].mxu1 }
 0x315   : > { %v3951_v49 = vadd.f32 %v3947_v47, %v3869_v46  ;;  %v4194_v50 = vpop.f32.mrb[38].mxu0  ;;  %v5293_v52 = vpop.f32.mrb[39].mxu1 }
 0x316   : > { %v5320_v54 = vpop.f32.mrb[39].mxu0 }
 0x317   : > { %v4033_v56 = vadd.f32 %v4029_v44, %v3951_v49 }
 0x31b   : > { %v4111_v57 = vpop.f32.mrb[40].mxu1 }
 0x31c   : > { %v4115_v37 = vadd.f32 %v4111_v57, %v4033_v56  ;;  %v4358_v51 = vpop.f32.mrb[40].mxu0  ;;  %v5311_v53 = vpop.f32.mrb[41].mxu1 }
 0x31d   : > { %v5338_v59 = vpop.f32.mrb[41].mxu0 }
 0x31e   : > { %v4198_v60 = vadd.f32 %v4194_v50, %v4115_v37 }
 0x321   : > { %v4276_v31 = vpop.f32.mrb[42].mxu1 }
 0x322   : > { %v4280_v61 = vadd.f32 %v4276_v31, %v4198_v60  ;;  %v5329_v62 = vpop.f32.mrb[43].mxu1 }
 0x324   : > { %v4362_v0 = vadd.f32 %v4358_v51, %v4280_v61 }
 0x327   : > { %v4440_v17 = vpop.f32.mrb[44].mxu1 }
 0x328   : > { %v4444_v1 = vadd.f32 %v4440_v17, %v4362_v0  ;;  %v5347_v3 = vpop.f32.mrb[45].mxu1 }
 0x32a   : > { %v4446_v4 = vadd.f32 %v4445_v36, %v4444_v1 }
 0x32c   : > { %v4447_v5 = vmax.f32 %v4446_v4, 0.0 }
 0x32e   : > { %5363 = vmatmul.mubr.msk.f32.vlgmr.msra.gmra.mrb[42].mxu0 %vm4456_vm9, %v4447_v5 }
 0x401   : > { %v4529_v58 = vpop.f32.mrb[42].mxu0 }
 0x402   : > { %v4530_v10 = vadd.f32 %v4529_v58, %v4455_v7  ;;  %v5364_v11 = vpop.f32.mrb[43].mxu0 }
 0x404   : > { %4534 = vst.msk [vmem:[%s324_s26] sm:$0x1] %vm4533_vm10, %v4530_v10 }
 0x405   : > { %5688 = shalt.err (!%p5685_p3)
}
 0x406   : > { %s5689_s22 = scalar_lea.hbm %s6545_s14, 16  ;;  %s5693_s26 = scalar_lea.hbm %s6596_s9, 32 }
 0x407   : > { %p5690_p4 = scmp.ne.s32.totalorder %s6545_s14, %s5689_s22  ;;  %p5694_p9 = scmp.lt.u32.totalorder %s6545_s14, %s6596_s9 }
 0x408   : > { %p5695_p10 = scmp.lt.u32.totalorder %s5693_s26, %s5689_s22  ;;  %p5697_p12 = scmp.lt.u32.totalorder %s5689_s22, %s6545_s14 }
 0x409   : > { %p5691_p7 = pnand %p5690_p4, %p5832_p5 }
 0x40a   : > { %p5696_p11 = por %p5695_p10, %p5694_p9 }
 0x40b   : > { %p5692_p8 = pneg %p5691_p7 }
 0x40c   : > { %p5698_p13 = por %p5697_p12, %p5696_p11 }
 0x40e   : > { %p5699_p0 = pnand %p5698_p13, %p5692_p8 }
 0x410   : > { %5702 = shalt.err (!%p5699_p0)
}
 0x411   : > { %5582 = dma.vmem_to_hbm [thread:$0]  (%p5832_p5), %s6547_s27, 16, %s6545_s14, %s4536_s16  }
 0x412 PF: > { %p5588_p1 = scmp.ge.s32.totalorder %s5737_s12, 2  ;;  %s4560_s17 = sand.u32 1, %s5725_s30  }
 0x413   : > { %s4561_s13 = scalar_lea.sflag [#allocation5], %s4560_s17 }
 0x414   : > { %p5585_p2 = pnand %p5588_p1, %p5836_p6 }
 0x416   : > { %5720 = dma.done.wait (!%p5585_p2), %s4561_s13, 16  }
 0x417   : > { %5722 = vsyncadd (!%p5585_p2), %s4561_s13, 4294967280  ;;  %p19_p3 = scmp.ge.s32.totalorder %s5819_s15, 4   ;;  %s6601_s30 = smov %s5729_s10 }
 0x418   : > { %s6602_s10 = smov %s5733_s11  ;;  %s6603_s11 = smov %s5830_s18 }
 0x419   : > { %s6604_s12 = smov %s5819_s15  ;;  %21 = sbr.rel (!%p19_p3) target bundleno = 3 (0x3), region = 137 }
 0x420   :  { %4565 = vsyncpa [#allocation5], 1 }
 0x421   :  { %4567 = vsyncpa [#allocation5 + $0x1], 1 }

</bundles_post_ra>
